<compile_context>
chip_gen: v6e
topology: v6e:2x2x1
jax: 0.10.0
libtpu: 0.0.40
codegen_flags: <defaults>
</compile_context>

<pallas_src>
import math
import jax
import jax.numpy as jnp
from jax.experimental import pallas as pl

D_MODEL = 32
N_HEADS = 4
D_HEAD = D_MODEL // N_HEADS
D_FF = 64
B = 2
S_TGT = 8
S_SRC = 8
EPS = 1e-5  # PyTorch nn.LayerNorm default

# ---- packed-slab layout (all offsets static, lane-0 / sublane-aligned) ------
_W_SA_QKV = 0      # rows 0..31   : (32, 96)  [wq*scale | wk | wv]
_W_SA_O   = 32     # rows 32..63  : (32, 32)
_W_CA_Q   = 64     # rows 64..95  : (32, 32)  wq*scale
_W_CA_KV  = 96     # rows 96..127 : (32, 64)  [wk | wv]
_W_CA_O   = 128    # rows 128..159: (32, 32)
_W_FF1    = 160    # rows 160..191: (32, 64)
_W_FF2    = 192    # rows 192..255: (64, 32)
W_ROWS = 256

(_V_SA_BQKV, _V_SA_BO, _V_CA_BQ, _V_CA_BKV, _V_CA_BO, _V_FF_B1, _V_FF_B2,
 _V_G1, _V_B1, _V_G2, _V_B2, _V_G3, _V_B3) = range(13)
V_ROWS = 16


# ---------------------------------------------------------------------------
# In-kernel helpers (traced into the single fused kernel)
# ---------------------------------------------------------------------------
def _split_heads(x2d):
    # (S, H*dh) -> (H, S, dh): static lane slices + stack (layout only)
    return jnp.stack(
        [x2d[:, h * D_HEAD:(h + 1) * D_HEAD] for h in range(N_HEADS)], axis=0)


def _merge_heads(x3d):
    # (H, S, dh) -> (S, H*dh)
    return jnp.concatenate([x3d[h] for h in range(N_HEADS)], axis=-1)


def _attention(q, k, v, mask):
    """q:(Sq,D) k,v:(Sk,D) mask:(Sq,Sk). 1/sqrt(dh) already folded into q."""
    qh, kh, vh = _split_heads(q), _split_heads(k), _split_heads(v)
    s = jnp.einsum('hqd,hkd->hqk', qh, kh,
                   preferred_element_type=jnp.float32)            # (H,Sq,Sk)
    s = s + mask[None, :, :]
    m = jnp.max(s, axis=-1, keepdims=True)
    p = jnp.exp(s - m)
    p = p / jnp.sum(p, axis=-1, keepdims=True)                     # exact softmax
    ctx = jnp.einsum('hqk,hkd->hqd', p, vh,
                     preferred_element_type=jnp.float32)           # (H,Sq,dh)
    return _merge_heads(ctx)                                       # (Sq,D)


def _add_norm(x, y, gamma, beta):
    s = x + y
    mu = jnp.mean(s, axis=-1, keepdims=True)
    var = jnp.mean((s - mu) ** 2, axis=-1, keepdims=True)
    return (s - mu) * jax.lax.rsqrt(var + EPS) * gamma + beta


# ---------------------------------------------------------------------------
# The single fused decoder-layer kernel (no grid: whole batch in one step)
# ---------------------------------------------------------------------------
def _decoder_layer_kernel(x_ref, enc_ref, tmask_ref, smask_ref,
                          w_ref, v_ref, out_ref):
    D, S, Sk = D_MODEL, S_TGT, S_SRC

    x = x_ref[...]          # (B*S_TGT, D)
    enc = enc_ref[...]      # (B*S_SRC, D)
    tgt_mask = tmask_ref[...]
    src_mask = smask_ref[...]

    def vec(row, width):    # (1, width) view-load from the vector slab
        return v_ref[row:row + 1, 0:width]

    # ---- self-attention: fused QKV projection (scale pre-folded into Q) ----
    qkv = jnp.dot(x, w_ref[_W_SA_QKV:_W_SA_QKV + D, 0:3 * D],
                  preferred_element_type=jnp.float32) + vec(_V_SA_BQKV, 3 * D)
    ctx = []
    for b in range(B):
        r = b * S
        ctx.append(_attention(qkv[r:r + S, 0:D],
                              qkv[r:r + S, D:2 * D],
                              qkv[r:r + S, 2 * D:3 * D],
                              tgt_mask))
    ctx = jnp.concatenate(ctx, axis=0)                              # (B*S, D)
    attn = jnp.dot(ctx, w_ref[_W_SA_O:_W_SA_O + D, 0:D],
                   preferred_element_type=jnp.float32) + vec(_V_SA_BO, D)
    x1 = _add_norm(x, attn, vec(_V_G1, D), vec(_V_B1, D))

    # ---- cross-attention: fused KV projection of encoder output ----
    qc = jnp.dot(x1, w_ref[_W_CA_Q:_W_CA_Q + D, 0:D],
                 preferred_element_type=jnp.float32) + vec(_V_CA_BQ, D)
    kvc = jnp.dot(enc, w_ref[_W_CA_KV:_W_CA_KV + D, 0:2 * D],
                  preferred_element_type=jnp.float32) + vec(_V_CA_BKV, 2 * D)
    ctx = []
    for b in range(B):
        rq, rk = b * S, b * Sk
        ctx.append(_attention(qc[rq:rq + S, :],
                              kvc[rk:rk + Sk, 0:D],
                              kvc[rk:rk + Sk, D:2 * D],
                              src_mask))
    ctx = jnp.concatenate(ctx, axis=0)
    cross = jnp.dot(ctx, w_ref[_W_CA_O:_W_CA_O + D, 0:D],
                    preferred_element_type=jnp.float32) + vec(_V_CA_BO, D)
    x2 = _add_norm(x1, cross, vec(_V_G2, D), vec(_V_B2, D))

    # ---- feed-forward ----
    h = jnp.dot(x2, w_ref[_W_FF1:_W_FF1 + D, 0:D_FF],
                preferred_element_type=jnp.float32) + vec(_V_FF_B1, D_FF)
    h = jnp.maximum(h, 0.0)
    ff = jnp.dot(h, w_ref[_W_FF2:_W_FF2 + D_FF, 0:D],
                 preferred_element_type=jnp.float32) + vec(_V_FF_B2, D)
    out_ref[...] = _add_norm(x2, ff, vec(_V_G3, D), vec(_V_B3, D))


# ---------------------------------------------------------------------------
# ONE-TIME host-side weight packing (not on the per-call path)
# ---------------------------------------------------------------------------
def pack_decoder_params(params):
    sa, ca, ff = params["self_attn"], params["cross_attn"], params["ffn"]
    scale = 1.0 / math.sqrt(D_HEAD)

    wslab = jnp.zeros((W_ROWS, 128), jnp.float32)

    def putw(slab, r0, w):
        return slab.at[r0:r0 + w.shape[0], 0:w.shape[1]].set(w)

    wslab = putw(wslab, _W_SA_QKV,
                 jnp.concatenate([sa["wq"] * scale, sa["wk"], sa["wv"]], 1))
    wslab = putw(wslab, _W_SA_O, sa["wo"])
    wslab = putw(wslab, _W_CA_Q, ca["wq"] * scale)
    wslab = putw(wslab, _W_CA_KV, jnp.concatenate([ca["wk"], ca["wv"]], 1))
    wslab = putw(wslab, _W_CA_O, ca["wo"])
    wslab = putw(wslab, _W_FF1, ff["w1"])
    wslab = putw(wslab, _W_FF2, ff["w2"])

    vslab = jnp.zeros((V_ROWS, 128), jnp.float32)

    def putv(slab, r, v):
        v = v.reshape(1, -1)
        return slab.at[r:r + 1, 0:v.shape[1]].set(v)

    vslab = putv(vslab, _V_SA_BQKV,
                 jnp.concatenate([sa["bq"] * scale, sa["bk"], sa["bv"]], 1))
    vslab = putv(vslab, _V_SA_BO, sa["bo"])
    vslab = putv(vslab, _V_CA_BQ, ca["bq"] * scale)
    vslab = putv(vslab, _V_CA_BKV, jnp.concatenate([ca["bk"], ca["bv"]], 1))
    vslab = putv(vslab, _V_CA_BO, ca["bo"])
    vslab = putv(vslab, _V_FF_B1, ff["b1"])
    vslab = putv(vslab, _V_FF_B2, ff["b2"])
    vslab = putv(vslab, _V_G1, params["norm1_g"])
    vslab = putv(vslab, _V_B1, params["norm1_b"])
    vslab = putv(vslab, _V_G2, params["norm2_g"])
    vslab = putv(vslab, _V_B2, params["norm2_b"])
    vslab = putv(vslab, _V_G3, params["norm3_g"])
    vslab = putv(vslab, _V_B3, params["norm3_b"])
    return dict(wslab=wslab, vslab=vslab)


# ---------------------------------------------------------------------------
# DecoderLayer forward: one grid-less pallas_call for the whole layer
# ---------------------------------------------------------------------------
@jax.jit
def decoder_layer(x, encoder_output, tgt_mask, src_mask, packed):
    Bx, Sq, D = x.shape
    Sk = encoder_output.shape[1]
    out = pl.pallas_call(
        _decoder_layer_kernel,
        out_shape=jax.ShapeDtypeStruct((Bx * Sq, D), jnp.float32),
    )(x.reshape(Bx * Sq, D), encoder_output.reshape(Bx * Sk, D),
      tgt_mask, src_mask, packed["wslab"], packed["vslab"])
    return out.reshape(Bx, Sq, D)


# ---------------------------------------------------------------------------
# Pure-JAX reference (for correctness check)
# ---------------------------------------------------------------------------
def _reference_mha(q_in, kv_in, mask, p):
    q = q_in @ p["wq"] + p["bq"]
    k = kv_in @ p["wk"] + p["bk"]
    v = kv_in @ p["wv"] + p["bv"]
    B_, Sq, D = q.shape
    Sk = k.shape[1]
    q = q.reshape(B_, Sq, N_HEADS, D_HEAD).transpose(0, 2, 1, 3)
    k = k.reshape(B_, Sk, N_HEADS, D_HEAD).transpose(0, 2, 1, 3)
    v = v.reshape(B_, Sk, N_HEADS, D_HEAD).transpose(0, 2, 1, 3)
    s = jnp.einsum('bhqd,bhkd->bhqk', q, k) / math.sqrt(D_HEAD)
    s = s + mask[None, None]
    a = jax.nn.softmax(s, axis=-1)
    ctx = jnp.einsum('bhqk,bhkd->bhqd', a, v)
    ctx = ctx.transpose(0, 2, 1, 3).reshape(B_, Sq, D)
    return ctx @ p["wo"] + p["bo"]


def _reference_ln(x, g, b):
    mu = jnp.mean(x, axis=-1, keepdims=True)
    var = jnp.mean((x - mu) ** 2, axis=-1, keepdims=True)
    return (x - mu) * jax.lax.rsqrt(var + EPS) * g + b


def decoder_layer_reference(x, enc, tgt_mask, src_mask, params):
    a = _reference_mha(x, x, tgt_mask, params["self_attn"])
    x = _reference_ln(x + a, params["norm1_g"], params["norm1_b"])
    c = _reference_mha(x, enc, src_mask, params["cross_attn"])
    x = _reference_ln(x + c, params["norm2_g"], params["norm2_b"])
    ff = params["ffn"]
    h = jax.nn.relu(x @ ff["w1"] + ff["b1"])
    f = h @ ff["w2"] + ff["b2"]
    x = _reference_ln(x + f, params["norm3_g"], params["norm3_b"])
    return x


# ---------------------------------------------------------------------------
# Deterministic parameter init (PyTorch-style uniform for weights & biases)
# ---------------------------------------------------------------------------
def init_params(key):
    keys = jax.random.split(key, 20)
    ki = iter(keys)

    def lin(din, dout):
        bound = 1.0 / math.sqrt(din)
        w = jax.random.uniform(next(ki), (din, dout), jnp.float32, -bound, bound)
        b = jax.random.uniform(next(ki), (1, dout), jnp.float32, -bound, bound)
        return w, b

    def attn_params():
        wq, bq = lin(D_MODEL, D_MODEL)
        wk, bk = lin(D_MODEL, D_MODEL)
        wv, bv = lin(D_MODEL, D_MODEL)
        wo, bo = lin(D_MODEL, D_MODEL)
        return dict(wq=wq, bq=bq, wk=wk, bk=bk, wv=wv, bv=bv, wo=wo, bo=bo)

    self_attn = attn_params()
    cross_attn = attn_params()
    w1, b1 = lin(D_MODEL, D_FF)
    w2, b2 = lin(D_FF, D_MODEL)

    ones = jnp.ones((1, D_MODEL), jnp.float32)
    zeros = jnp.zeros((1, D_MODEL), jnp.float32)
    return dict(
        self_attn=self_attn,
        cross_attn=cross_attn,
        ffn=dict(w1=w1, b1=b1, w2=w2, b2=b2),
        norm1_g=ones, norm1_b=zeros,
        norm2_g=ones, norm2_b=zeros,
        norm3_g=ones, norm3_b=zeros,
    )


if __name__ == "__main__":
    key = jax.random.PRNGKey(0)
    k_x, k_enc, k_p = jax.random.split(key, 3)

    x = jax.random.normal(k_x, (B, S_TGT, D_MODEL), jnp.float32)
    encoder_output = jax.random.normal(k_enc, (B, S_SRC, D_MODEL), jnp.float32)
    params = init_params(k_p)

    # Pack weights ONCE (init-time layout plumbing; not on the forward path).
    packed = pack_decoder_params(params)

    # causal (tgt) mask as additive bias; src mask = no masking
    causal = jnp.tril(jnp.ones((S_TGT, S_TGT), jnp.float32))
    tgt_mask = jnp.where(causal > 0, 0.0, -1e9).astype(jnp.float32)
    src_mask = jnp.zeros((S_TGT, S_SRC), jnp.float32)

    out = decoder_layer(x, encoder_output, tgt_mask, src_mask, packed)
    out = jax.block_until_ready(out)
    assert out.shape == (B, S_TGT, D_MODEL)

    ref = decoder_layer_reference(x, encoder_output, tgt_mask, src_mask, params)
    max_err = float(jnp.max(jnp.abs(out - ref)))
    assert max_err < 2e-2, f"max abs err {max_err}"
    print("KERNEL_OK")
</pallas_src>

<mosaic_0001>
module attributes {stable_mosaic.version = 11 : i64} {
  func.func @_decoder_layer_kernel(%arg0: memref<16x32xf32, #tpu.memory_space<vmem>>, %arg1: memref<16x32xf32, #tpu.memory_space<vmem>>, %arg2: memref<8x8xf32, #tpu.memory_space<vmem>>, %arg3: memref<8x8xf32, #tpu.memory_space<vmem>>, %arg4: memref<256x128xf32, #tpu.memory_space<vmem>>, %arg5: memref<16x128xf32, #tpu.memory_space<vmem>>, %arg6: memref<16x32xf32, #tpu.memory_space<vmem>>) attributes {dimension_semantics = [], scalar_prefetch = 0 : i64, scratch_operands = 0 : i64, tpu.core_type = #tpu.core_type<tc>} {
    %c0 = arith.constant 0 : index
    %c0_0 = arith.constant 0 : index
    %0 = vector.load %arg0[%c0, %c0_0] : memref<16x32xf32, #tpu.memory_space<vmem>>, vector<16x32xf32>
    %c0_1 = arith.constant 0 : index
    %c0_2 = arith.constant 0 : index
    %1 = vector.load %arg1[%c0_1, %c0_2] : memref<16x32xf32, #tpu.memory_space<vmem>>, vector<16x32xf32>
    %c0_3 = arith.constant 0 : index
    %c0_4 = arith.constant 0 : index
    %2 = vector.load %arg2[%c0_3, %c0_4] : memref<8x8xf32, #tpu.memory_space<vmem>>, vector<8x8xf32>
    %c0_5 = arith.constant 0 : index
    %c0_6 = arith.constant 0 : index
    %3 = vector.load %arg3[%c0_5, %c0_6] : memref<8x8xf32, #tpu.memory_space<vmem>>, vector<8x8xf32>
    %c0_7 = arith.constant 0 : index
    %c0_8 = arith.constant 0 : index
    %4 = vector.load %arg4[%c0_7, %c0_8] : memref<256x128xf32, #tpu.memory_space<vmem>>, vector<32x96xf32>
    %cst = arith.constant dense<0.000000e+00> : vector<16x96xf32>
    %5 = tpu.matmul %0, %4, %cst {dimension_numbers = #tpu.dot_dimension_numbers<[1], [0], [0], [1], [0, 0, 1, 1], [], []>} : vector<16x32xf32>, vector<32x96xf32>, vector<16x96xf32> -> vector<16x96xf32>
    %c0_9 = arith.constant 0 : index
    %c0_10 = arith.constant 0 : index
    %6 = vector.load %arg5[%c0_9, %c0_10] : memref<16x128xf32, #tpu.memory_space<vmem>>, vector<1x96xf32>
    %7 = vector.broadcast %6 : vector<1x96xf32> to vector<16x96xf32>
    %8 = arith.addf %5, %7 : vector<16x96xf32>
    %9 = vector.extract_strided_slice %8 {offsets = [0, 0], sizes = [8, 32], strides = [1, 1]} : vector<16x96xf32> to vector<8x32xf32>
    %10 = vector.extract_strided_slice %8 {offsets = [0, 32], sizes = [8, 32], strides = [1, 1]} : vector<16x96xf32> to vector<8x32xf32>
    %11 = vector.extract_strided_slice %8 {offsets = [0, 64], sizes = [8, 32], strides = [1, 1]} : vector<16x96xf32> to vector<8x32xf32>
    %12 = vector.extract_strided_slice %9 {offsets = [0, 0], sizes = [8, 8], strides = [1, 1]} : vector<8x32xf32> to vector<8x8xf32>
    %13 = vector.extract_strided_slice %9 {offsets = [0, 8], sizes = [8, 8], strides = [1, 1]} : vector<8x32xf32> to vector<8x8xf32>
    %14 = vector.extract_strided_slice %9 {offsets = [0, 16], sizes = [8, 8], strides = [1, 1]} : vector<8x32xf32> to vector<8x8xf32>
    %15 = vector.extract_strided_slice %9 {offsets = [0, 24], sizes = [8, 8], strides = [1, 1]} : vector<8x32xf32> to vector<8x8xf32>
    %16 = vector.shape_cast %12 : vector<8x8xf32> to vector<1x8x8xf32>
    %17 = vector.shape_cast %13 : vector<8x8xf32> to vector<1x8x8xf32>
    %18 = vector.shape_cast %14 : vector<8x8xf32> to vector<1x8x8xf32>
    %19 = vector.shape_cast %15 : vector<8x8xf32> to vector<1x8x8xf32>
    %20 = tpu.concatenate %16, %17, %18, %19 in 0 : vector<1x8x8xf32>, vector<1x8x8xf32>, vector<1x8x8xf32>, vector<1x8x8xf32> -> vector<4x8x8xf32>
    %21 = vector.extract_strided_slice %10 {offsets = [0, 0], sizes = [8, 8], strides = [1, 1]} : vector<8x32xf32> to vector<8x8xf32>
    %22 = vector.extract_strided_slice %10 {offsets = [0, 8], sizes = [8, 8], strides = [1, 1]} : vector<8x32xf32> to vector<8x8xf32>
    %23 = vector.extract_strided_slice %10 {offsets = [0, 16], sizes = [8, 8], strides = [1, 1]} : vector<8x32xf32> to vector<8x8xf32>
    %24 = vector.extract_strided_slice %10 {offsets = [0, 24], sizes = [8, 8], strides = [1, 1]} : vector<8x32xf32> to vector<8x8xf32>
    %25 = vector.shape_cast %21 : vector<8x8xf32> to vector<1x8x8xf32>
    %26 = vector.shape_cast %22 : vector<8x8xf32> to vector<1x8x8xf32>
    %27 = vector.shape_cast %23 : vector<8x8xf32> to vector<1x8x8xf32>
    %28 = vector.shape_cast %24 : vector<8x8xf32> to vector<1x8x8xf32>
    %29 = tpu.concatenate %25, %26, %27, %28 in 0 : vector<1x8x8xf32>, vector<1x8x8xf32>, vector<1x8x8xf32>, vector<1x8x8xf32> -> vector<4x8x8xf32>
    %30 = vector.extract_strided_slice %11 {offsets = [0, 0], sizes = [8, 8], strides = [1, 1]} : vector<8x32xf32> to vector<8x8xf32>
    %31 = vector.extract_strided_slice %11 {offsets = [0, 8], sizes = [8, 8], strides = [1, 1]} : vector<8x32xf32> to vector<8x8xf32>
    %32 = vector.extract_strided_slice %11 {offsets = [0, 16], sizes = [8, 8], strides = [1, 1]} : vector<8x32xf32> to vector<8x8xf32>
    %33 = vector.extract_strided_slice %11 {offsets = [0, 24], sizes = [8, 8], strides = [1, 1]} : vector<8x32xf32> to vector<8x8xf32>
    %34 = vector.shape_cast %30 : vector<8x8xf32> to vector<1x8x8xf32>
    %35 = vector.shape_cast %31 : vector<8x8xf32> to vector<1x8x8xf32>
    %36 = vector.shape_cast %32 : vector<8x8xf32> to vector<1x8x8xf32>
    %37 = vector.shape_cast %33 : vector<8x8xf32> to vector<1x8x8xf32>
    %38 = tpu.concatenate %34, %35, %36, %37 in 0 : vector<1x8x8xf32>, vector<1x8x8xf32>, vector<1x8x8xf32>, vector<1x8x8xf32> -> vector<4x8x8xf32>
    "tpu.trace_start"() <{level = 10 : i32, message = "hqd,hkd->hqk"}> : () -> ()
    %cst_11 = arith.constant dense<0.000000e+00> : vector<4x8x8xf32>
    %39 = tpu.matmul %20, %29, %cst_11 {dimension_numbers = #tpu.dot_dimension_numbers<[2], [2], [1], [1], [0, 0, 0, 1, 1, 1], [0], [0]>} : vector<4x8x8xf32>, vector<4x8x8xf32>, vector<4x8x8xf32> -> vector<4x8x8xf32>
    "tpu.trace_stop"() : () -> ()
    %40 = vector.shape_cast %2 : vector<8x8xf32> to vector<1x8x8xf32>
    %41 = vector.broadcast %40 : vector<1x8x8xf32> to vector<4x8x8xf32>
    %42 = arith.addf %39, %41 : vector<4x8x8xf32>
    %cst_12 = arith.constant dense<0xFF800000> : vector<4x8xf32>
    %43 = vector.multi_reduction <maximumf>, %42, %cst_12 [2] : vector<4x8x8xf32> to vector<4x8xf32>
    %44 = vector.shape_cast %43 : vector<4x8xf32> to vector<4x8x1xf32>
    %45 = vector.broadcast %44 : vector<4x8x1xf32> to vector<4x8x8xf32>
    %46 = arith.subf %42, %45 : vector<4x8x8xf32>
    %47 = math.exp %46 : vector<4x8x8xf32>
    %cst_13 = arith.constant dense<0.000000e+00> : vector<4x8xf32>
    %48 = vector.multi_reduction <add>, %47, %cst_13 [2] : vector<4x8x8xf32> to vector<4x8xf32>
    %49 = vector.shape_cast %48 : vector<4x8xf32> to vector<4x8x1xf32>
    %50 = vector.broadcast %49 : vector<4x8x1xf32> to vector<4x8x8xf32>
    %51 = arith.divf %47, %50 : vector<4x8x8xf32>
    "tpu.trace_start"() <{level = 10 : i32, message = "hqk,hkd->hqd"}> : () -> ()
    %cst_14 = arith.constant dense<0.000000e+00> : vector<4x8x8xf32>
    %52 = tpu.matmul %51, %38, %cst_14 {dimension_numbers = #tpu.dot_dimension_numbers<[2], [1], [1], [2], [0, 0, 0, 1, 1, 2], [0], [0]>} : vector<4x8x8xf32>, vector<4x8x8xf32>, vector<4x8x8xf32> -> vector<4x8x8xf32>
    "tpu.trace_stop"() : () -> ()
    %53 = vector.extract_strided_slice %52 {offsets = [0, 0, 0], sizes = [1, 8, 8], strides = [1, 1, 1]} : vector<4x8x8xf32> to vector<1x8x8xf32>
    %54 = vector.shape_cast %53 : vector<1x8x8xf32> to vector<8x8xf32>
    %55 = vector.extract_strided_slice %52 {offsets = [1, 0, 0], sizes = [1, 8, 8], strides = [1, 1, 1]} : vector<4x8x8xf32> to vector<1x8x8xf32>
    %56 = vector.shape_cast %55 : vector<1x8x8xf32> to vector<8x8xf32>
    %57 = vector.extract_strided_slice %52 {offsets = [2, 0, 0], sizes = [1, 8, 8], strides = [1, 1, 1]} : vector<4x8x8xf32> to vector<1x8x8xf32>
    %58 = vector.shape_cast %57 : vector<1x8x8xf32> to vector<8x8xf32>
    %59 = vector.extract_strided_slice %52 {offsets = [3, 0, 0], sizes = [1, 8, 8], strides = [1, 1, 1]} : vector<4x8x8xf32> to vector<1x8x8xf32>
    %60 = vector.shape_cast %59 : vector<1x8x8xf32> to vector<8x8xf32>
    %61 = tpu.concatenate %54, %56, %58, %60 in 1 : vector<8x8xf32>, vector<8x8xf32>, vector<8x8xf32>, vector<8x8xf32> -> vector<8x32xf32>
    %62 = vector.extract_strided_slice %8 {offsets = [8, 0], sizes = [8, 32], strides = [1, 1]} : vector<16x96xf32> to vector<8x32xf32>
    %63 = vector.extract_strided_slice %8 {offsets = [8, 32], sizes = [8, 32], strides = [1, 1]} : vector<16x96xf32> to vector<8x32xf32>
    %64 = vector.extract_strided_slice %8 {offsets = [8, 64], sizes = [8, 32], strides = [1, 1]} : vector<16x96xf32> to vector<8x32xf32>
    %65 = vector.extract_strided_slice %62 {offsets = [0, 0], sizes = [8, 8], strides = [1, 1]} : vector<8x32xf32> to vector<8x8xf32>
    %66 = vector.extract_strided_slice %62 {offsets = [0, 8], sizes = [8, 8], strides = [1, 1]} : vector<8x32xf32> to vector<8x8xf32>
    %67 = vector.extract_strided_slice %62 {offsets = [0, 16], sizes = [8, 8], strides = [1, 1]} : vector<8x32xf32> to vector<8x8xf32>
    %68 = vector.extract_strided_slice %62 {offsets = [0, 24], sizes = [8, 8], strides = [1, 1]} : vector<8x32xf32> to vector<8x8xf32>
    %69 = vector.shape_cast %65 : vector<8x8xf32> to vector<1x8x8xf32>
    %70 = vector.shape_cast %66 : vector<8x8xf32> to vector<1x8x8xf32>
    %71 = vector.shape_cast %67 : vector<8x8xf32> to vector<1x8x8xf32>
    %72 = vector.shape_cast %68 : vector<8x8xf32> to vector<1x8x8xf32>
    %73 = tpu.concatenate %69, %70, %71, %72 in 0 : vector<1x8x8xf32>, vector<1x8x8xf32>, vector<1x8x8xf32>, vector<1x8x8xf32> -> vector<4x8x8xf32>
    %74 = vector.extract_strided_slice %63 {offsets = [0, 0], sizes = [8, 8], strides = [1, 1]} : vector<8x32xf32> to vector<8x8xf32>
    %75 = vector.extract_strided_slice %63 {offsets = [0, 8], sizes = [8, 8], strides = [1, 1]} : vector<8x32xf32> to vector<8x8xf32>
    %76 = vector.extract_strided_slice %63 {offsets = [0, 16], sizes = [8, 8], strides = [1, 1]} : vector<8x32xf32> to vector<8x8xf32>
    %77 = vector.extract_strided_slice %63 {offsets = [0, 24], sizes = [8, 8], strides = [1, 1]} : vector<8x32xf32> to vector<8x8xf32>
    %78 = vector.shape_cast %74 : vector<8x8xf32> to vector<1x8x8xf32>
    %79 = vector.shape_cast %75 : vector<8x8xf32> to vector<1x8x8xf32>
    %80 = vector.shape_cast %76 : vector<8x8xf32> to vector<1x8x8xf32>
    %81 = vector.shape_cast %77 : vector<8x8xf32> to vector<1x8x8xf32>
    %82 = tpu.concatenate %78, %79, %80, %81 in 0 : vector<1x8x8xf32>, vector<1x8x8xf32>, vector<1x8x8xf32>, vector<1x8x8xf32> -> vector<4x8x8xf32>
    %83 = vector.extract_strided_slice %64 {offsets = [0, 0], sizes = [8, 8], strides = [1, 1]} : vector<8x32xf32> to vector<8x8xf32>
    %84 = vector.extract_strided_slice %64 {offsets = [0, 8], sizes = [8, 8], strides = [1, 1]} : vector<8x32xf32> to vector<8x8xf32>
    %85 = vector.extract_strided_slice %64 {offsets = [0, 16], sizes = [8, 8], strides = [1, 1]} : vector<8x32xf32> to vector<8x8xf32>
    %86 = vector.extract_strided_slice %64 {offsets = [0, 24], sizes = [8, 8], strides = [1, 1]} : vector<8x32xf32> to vector<8x8xf32>
    %87 = vector.shape_cast %83 : vector<8x8xf32> to vector<1x8x8xf32>
    %88 = vector.shape_cast %84 : vector<8x8xf32> to vector<1x8x8xf32>
    %89 = vector.shape_cast %85 : vector<8x8xf32> to vector<1x8x8xf32>
    %90 = vector.shape_cast %86 : vector<8x8xf32> to vector<1x8x8xf32>
    %91 = tpu.concatenate %87, %88, %89, %90 in 0 : vector<1x8x8xf32>, vector<1x8x8xf32>, vector<1x8x8xf32>, vector<1x8x8xf32> -> vector<4x8x8xf32>
    "tpu.trace_start"() <{level = 10 : i32, message = "hqd,hkd->hqk"}> : () -> ()
    %cst_15 = arith.constant dense<0.000000e+00> : vector<4x8x8xf32>
    %92 = tpu.matmul %73, %82, %cst_15 {dimension_numbers = #tpu.dot_dimension_numbers<[2], [2], [1], [1], [0, 0, 0, 1, 1, 1], [0], [0]>} : vector<4x8x8xf32>, vector<4x8x8xf32>, vector<4x8x8xf32> -> vector<4x8x8xf32>
    "tpu.trace_stop"() : () -> ()
    %93 = vector.shape_cast %2 : vector<8x8xf32> to vector<1x8x8xf32>
    %94 = vector.broadcast %93 : vector<1x8x8xf32> to vector<4x8x8xf32>
    %95 = arith.addf %92, %94 : vector<4x8x8xf32>
    %cst_16 = arith.constant dense<0xFF800000> : vector<4x8xf32>
    %96 = vector.multi_reduction <maximumf>, %95, %cst_16 [2] : vector<4x8x8xf32> to vector<4x8xf32>
    %97 = vector.shape_cast %96 : vector<4x8xf32> to vector<4x8x1xf32>
    %98 = vector.broadcast %97 : vector<4x8x1xf32> to vector<4x8x8xf32>
    %99 = arith.subf %95, %98 : vector<4x8x8xf32>
    %100 = math.exp %99 : vector<4x8x8xf32>
    %cst_17 = arith.constant dense<0.000000e+00> : vector<4x8xf32>
    %101 = vector.multi_reduction <add>, %100, %cst_17 [2] : vector<4x8x8xf32> to vector<4x8xf32>
    %102 = vector.shape_cast %101 : vector<4x8xf32> to vector<4x8x1xf32>
    %103 = vector.broadcast %102 : vector<4x8x1xf32> to vector<4x8x8xf32>
    %104 = arith.divf %100, %103 : vector<4x8x8xf32>
    "tpu.trace_start"() <{level = 10 : i32, message = "hqk,hkd->hqd"}> : () -> ()
    %cst_18 = arith.constant dense<0.000000e+00> : vector<4x8x8xf32>
    %105 = tpu.matmul %104, %91, %cst_18 {dimension_numbers = #tpu.dot_dimension_numbers<[2], [1], [1], [2], [0, 0, 0, 1, 1, 2], [0], [0]>} : vector<4x8x8xf32>, vector<4x8x8xf32>, vector<4x8x8xf32> -> vector<4x8x8xf32>
    "tpu.trace_stop"() : () -> ()
    %106 = vector.extract_strided_slice %105 {offsets = [0, 0, 0], sizes = [1, 8, 8], strides = [1, 1, 1]} : vector<4x8x8xf32> to vector<1x8x8xf32>
    %107 = vector.shape_cast %106 : vector<1x8x8xf32> to vector<8x8xf32>
    %108 = vector.extract_strided_slice %105 {offsets = [1, 0, 0], sizes = [1, 8, 8], strides = [1, 1, 1]} : vector<4x8x8xf32> to vector<1x8x8xf32>
    %109 = vector.shape_cast %108 : vector<1x8x8xf32> to vector<8x8xf32>
    %110 = vector.extract_strided_slice %105 {offsets = [2, 0, 0], sizes = [1, 8, 8], strides = [1, 1, 1]} : vector<4x8x8xf32> to vector<1x8x8xf32>
    %111 = vector.shape_cast %110 : vector<1x8x8xf32> to vector<8x8xf32>
    %112 = vector.extract_strided_slice %105 {offsets = [3, 0, 0], sizes = [1, 8, 8], strides = [1, 1, 1]} : vector<4x8x8xf32> to vector<1x8x8xf32>
    %113 = vector.shape_cast %112 : vector<1x8x8xf32> to vector<8x8xf32>
    %114 = tpu.concatenate %107, %109, %111, %113 in 1 : vector<8x8xf32>, vector<8x8xf32>, vector<8x8xf32>, vector<8x8xf32> -> vector<8x32xf32>
    %115 = tpu.concatenate %61, %114 in 0 : vector<8x32xf32>, vector<8x32xf32> -> vector<16x32xf32>
    %c32 = arith.constant 32 : index
    %c0_19 = arith.constant 0 : index
    %116 = vector.load %arg4[%c32, %c0_19] : memref<256x128xf32, #tpu.memory_space<vmem>>, vector<32x32xf32>
    %cst_20 = arith.constant dense<0.000000e+00> : vector<16x32xf32>
    %117 = tpu.matmul %115, %116, %cst_20 {dimension_numbers = #tpu.dot_dimension_numbers<[1], [0], [0], [1], [0, 0, 1, 1], [], []>} : vector<16x32xf32>, vector<32x32xf32>, vector<16x32xf32> -> vector<16x32xf32>
    %c1 = arith.constant 1 : index
    %c0_21 = arith.constant 0 : index
    %118 = vector.load %arg5[%c1, %c0_21] : memref<16x128xf32, #tpu.memory_space<vmem>>, vector<1x32xf32>
    %119 = vector.broadcast %118 : vector<1x32xf32> to vector<16x32xf32>
    %120 = arith.addf %117, %119 : vector<16x32xf32>
    %c7 = arith.constant 7 : index
    %c0_22 = arith.constant 0 : index
    %121 = vector.load %arg5[%c7, %c0_22] : memref<16x128xf32, #tpu.memory_space<vmem>>, vector<1x32xf32>
    %c8 = arith.constant 8 : index
    %c0_23 = arith.constant 0 : index
    %122 = vector.load %arg5[%c8, %c0_23] : memref<16x128xf32, #tpu.memory_space<vmem>>, vector<1x32xf32>
    %123 = arith.addf %0, %120 : vector<16x32xf32>
    %cst_24 = arith.constant dense<0.000000e+00> : vector<16xf32>
    %124 = vector.multi_reduction <add>, %123, %cst_24 [1] : vector<16x32xf32> to vector<16xf32>
    %125 = vector.shape_cast %124 : vector<16xf32> to vector<16x1xf32>
    %cst_25 = arith.constant 3.200000e+01 : f32
    %126 = vector.broadcast %cst_25 : f32 to vector<16x1xf32>
    %127 = arith.divf %125, %126 : vector<16x1xf32>
    %128 = vector.broadcast %127 : vector<16x1xf32> to vector<16x32xf32>
    %129 = arith.subf %123, %128 : vector<16x32xf32>
    %130 = arith.mulf %129, %129 : vector<16x32xf32>
    %cst_26 = arith.constant dense<0.000000e+00> : vector<16xf32>
    %131 = vector.multi_reduction <add>, %130, %cst_26 [1] : vector<16x32xf32> to vector<16xf32>
    %132 = vector.shape_cast %131 : vector<16xf32> to vector<16x1xf32>
    %cst_27 = arith.constant 3.200000e+01 : f32
    %133 = vector.broadcast %cst_27 : f32 to vector<16x1xf32>
    %134 = arith.divf %132, %133 : vector<16x1xf32>
    %135 = vector.broadcast %127 : vector<16x1xf32> to vector<16x32xf32>
    %136 = arith.subf %123, %135 : vector<16x32xf32>
    %cst_28 = arith.constant 9.99999974E-6 : f32
    %137 = vector.broadcast %cst_28 : f32 to vector<16x1xf32>
    %138 = arith.addf %134, %137 : vector<16x1xf32>
    %139 = math.rsqrt %138 : vector<16x1xf32>
    %140 = vector.broadcast %139 : vector<16x1xf32> to vector<16x32xf32>
    %141 = arith.mulf %136, %140 : vector<16x32xf32>
    %142 = vector.broadcast %121 : vector<1x32xf32> to vector<16x32xf32>
    %143 = arith.mulf %141, %142 : vector<16x32xf32>
    %144 = vector.broadcast %122 : vector<1x32xf32> to vector<16x32xf32>
    %145 = arith.addf %143, %144 : vector<16x32xf32>
    %c64 = arith.constant 64 : index
    %c0_29 = arith.constant 0 : index
    %146 = vector.load %arg4[%c64, %c0_29] : memref<256x128xf32, #tpu.memory_space<vmem>>, vector<32x32xf32>
    %cst_30 = arith.constant dense<0.000000e+00> : vector<16x32xf32>
    %147 = tpu.matmul %145, %146, %cst_30 {dimension_numbers = #tpu.dot_dimension_numbers<[1], [0], [0], [1], [0, 0, 1, 1], [], []>} : vector<16x32xf32>, vector<32x32xf32>, vector<16x32xf32> -> vector<16x32xf32>
    %c2 = arith.constant 2 : index
    %c0_31 = arith.constant 0 : index
    %148 = vector.load %arg5[%c2, %c0_31] : memref<16x128xf32, #tpu.memory_space<vmem>>, vector<1x32xf32>
    %149 = vector.broadcast %148 : vector<1x32xf32> to vector<16x32xf32>
    %150 = arith.addf %147, %149 : vector<16x32xf32>
    %c96 = arith.constant 96 : index
    %c0_32 = arith.constant 0 : index
    %151 = vector.load %arg4[%c96, %c0_32] : memref<256x128xf32, #tpu.memory_space<vmem>>, vector<32x64xf32>
    %cst_33 = arith.constant dense<0.000000e+00> : vector<16x64xf32>
    %152 = tpu.matmul %1, %151, %cst_33 {dimension_numbers = #tpu.dot_dimension_numbers<[1], [0], [0], [1], [0, 0, 1, 1], [], []>} : vector<16x32xf32>, vector<32x64xf32>, vector<16x64xf32> -> vector<16x64xf32>
    %c3 = arith.constant 3 : index
    %c0_34 = arith.constant 0 : index
    %153 = vector.load %arg5[%c3, %c0_34] : memref<16x128xf32, #tpu.memory_space<vmem>>, vector<1x64xf32>
    %154 = vector.broadcast %153 : vector<1x64xf32> to vector<16x64xf32>
    %155 = arith.addf %152, %154 : vector<16x64xf32>
    %156 = vector.extract_strided_slice %150 {offsets = [0, 0], sizes = [8, 32], strides = [1, 1]} : vector<16x32xf32> to vector<8x32xf32>
    %157 = vector.extract_strided_slice %155 {offsets = [0, 0], sizes = [8, 32], strides = [1, 1]} : vector<16x64xf32> to vector<8x32xf32>
    %158 = vector.extract_strided_slice %155 {offsets = [0, 32], sizes = [8, 32], strides = [1, 1]} : vector<16x64xf32> to vector<8x32xf32>
    %159 = vector.extract_strided_slice %156 {offsets = [0, 0], sizes = [8, 8], strides = [1, 1]} : vector<8x32xf32> to vector<8x8xf32>
    %160 = vector.extract_strided_slice %156 {offsets = [0, 8], sizes = [8, 8], strides = [1, 1]} : vector<8x32xf32> to vector<8x8xf32>
    %161 = vector.extract_strided_slice %156 {offsets = [0, 16], sizes = [8, 8], strides = [1, 1]} : vector<8x32xf32> to vector<8x8xf32>
    %162 = vector.extract_strided_slice %156 {offsets = [0, 24], sizes = [8, 8], strides = [1, 1]} : vector<8x32xf32> to vector<8x8xf32>
    %163 = vector.shape_cast %159 : vector<8x8xf32> to vector<1x8x8xf32>
    %164 = vector.shape_cast %160 : vector<8x8xf32> to vector<1x8x8xf32>
    %165 = vector.shape_cast %161 : vector<8x8xf32> to vector<1x8x8xf32>
    %166 = vector.shape_cast %162 : vector<8x8xf32> to vector<1x8x8xf32>
    %167 = tpu.concatenate %163, %164, %165, %166 in 0 : vector<1x8x8xf32>, vector<1x8x8xf32>, vector<1x8x8xf32>, vector<1x8x8xf32> -> vector<4x8x8xf32>
    %168 = vector.extract_strided_slice %157 {offsets = [0, 0], sizes = [8, 8], strides = [1, 1]} : vector<8x32xf32> to vector<8x8xf32>
    %169 = vector.extract_strided_slice %157 {offsets = [0, 8], sizes = [8, 8], strides = [1, 1]} : vector<8x32xf32> to vector<8x8xf32>
    %170 = vector.extract_strided_slice %157 {offsets = [0, 16], sizes = [8, 8], strides = [1, 1]} : vector<8x32xf32> to vector<8x8xf32>
    %171 = vector.extract_strided_slice %157 {offsets = [0, 24], sizes = [8, 8], strides = [1, 1]} : vector<8x32xf32> to vector<8x8xf32>
    %172 = vector.shape_cast %168 : vector<8x8xf32> to vector<1x8x8xf32>
    %173 = vector.shape_cast %169 : vector<8x8xf32> to vector<1x8x8xf32>
    %174 = vector.shape_cast %170 : vector<8x8xf32> to vector<1x8x8xf32>
    %175 = vector.shape_cast %171 : vector<8x8xf32> to vector<1x8x8xf32>
    %176 = tpu.concatenate %172, %173, %174, %175 in 0 : vector<1x8x8xf32>, vector<1x8x8xf32>, vector<1x8x8xf32>, vector<1x8x8xf32> -> vector<4x8x8xf32>
    %177 = vector.extract_strided_slice %158 {offsets = [0, 0], sizes = [8, 8], strides = [1, 1]} : vector<8x32xf32> to vector<8x8xf32>
    %178 = vector.extract_strided_slice %158 {offsets = [0, 8], sizes = [8, 8], strides = [1, 1]} : vector<8x32xf32> to vector<8x8xf32>
    %179 = vector.extract_strided_slice %158 {offsets = [0, 16], sizes = [8, 8], strides = [1, 1]} : vector<8x32xf32> to vector<8x8xf32>
    %180 = vector.extract_strided_slice %158 {offsets = [0, 24], sizes = [8, 8], strides = [1, 1]} : vector<8x32xf32> to vector<8x8xf32>
    %181 = vector.shape_cast %177 : vector<8x8xf32> to vector<1x8x8xf32>
    %182 = vector.shape_cast %178 : vector<8x8xf32> to vector<1x8x8xf32>
    %183 = vector.shape_cast %179 : vector<8x8xf32> to vector<1x8x8xf32>
    %184 = vector.shape_cast %180 : vector<8x8xf32> to vector<1x8x8xf32>
    %185 = tpu.concatenate %181, %182, %183, %184 in 0 : vector<1x8x8xf32>, vector<1x8x8xf32>, vector<1x8x8xf32>, vector<1x8x8xf32> -> vector<4x8x8xf32>
    "tpu.trace_start"() <{level = 10 : i32, message = "hqd,hkd->hqk"}> : () -> ()
    %cst_35 = arith.constant dense<0.000000e+00> : vector<4x8x8xf32>
    %186 = tpu.matmul %167, %176, %cst_35 {dimension_numbers = #tpu.dot_dimension_numbers<[2], [2], [1], [1], [0, 0, 0, 1, 1, 1], [0], [0]>} : vector<4x8x8xf32>, vector<4x8x8xf32>, vector<4x8x8xf32> -> vector<4x8x8xf32>
    "tpu.trace_stop"() : () -> ()
    %187 = vector.shape_cast %3 : vector<8x8xf32> to vector<1x8x8xf32>
    %188 = vector.broadcast %187 : vector<1x8x8xf32> to vector<4x8x8xf32>
    %189 = arith.addf %186, %188 : vector<4x8x8xf32>
    %cst_36 = arith.constant dense<0xFF800000> : vector<4x8xf32>
    %190 = vector.multi_reduction <maximumf>, %189, %cst_36 [2] : vector<4x8x8xf32> to vector<4x8xf32>
    %191 = vector.shape_cast %190 : vector<4x8xf32> to vector<4x8x1xf32>
    %192 = vector.broadcast %191 : vector<4x8x1xf32> to vector<4x8x8xf32>
    %193 = arith.subf %189, %192 : vector<4x8x8xf32>
    %194 = math.exp %193 : vector<4x8x8xf32>
    %cst_37 = arith.constant dense<0.000000e+00> : vector<4x8xf32>
    %195 = vector.multi_reduction <add>, %194, %cst_37 [2] : vector<4x8x8xf32> to vector<4x8xf32>
    %196 = vector.shape_cast %195 : vector<4x8xf32> to vector<4x8x1xf32>
    %197 = vector.broadcast %196 : vector<4x8x1xf32> to vector<4x8x8xf32>
    %198 = arith.divf %194, %197 : vector<4x8x8xf32>
    "tpu.trace_start"() <{level = 10 : i32, message = "hqk,hkd->hqd"}> : () -> ()
    %cst_38 = arith.constant dense<0.000000e+00> : vector<4x8x8xf32>
    %199 = tpu.matmul %198, %185, %cst_38 {dimension_numbers = #tpu.dot_dimension_numbers<[2], [1], [1], [2], [0, 0, 0, 1, 1, 2], [0], [0]>} : vector<4x8x8xf32>, vector<4x8x8xf32>, vector<4x8x8xf32> -> vector<4x8x8xf32>
    "tpu.trace_stop"() : () -> ()
    %200 = vector.extract_strided_slice %199 {offsets = [0, 0, 0], sizes = [1, 8, 8], strides = [1, 1, 1]} : vector<4x8x8xf32> to vector<1x8x8xf32>
    %201 = vector.shape_cast %200 : vector<1x8x8xf32> to vector<8x8xf32>
    %202 = vector.extract_strided_slice %199 {offsets = [1, 0, 0], sizes = [1, 8, 8], strides = [1, 1, 1]} : vector<4x8x8xf32> to vector<1x8x8xf32>
    %203 = vector.shape_cast %202 : vector<1x8x8xf32> to vector<8x8xf32>
    %204 = vector.extract_strided_slice %199 {offsets = [2, 0, 0], sizes = [1, 8, 8], strides = [1, 1, 1]} : vector<4x8x8xf32> to vector<1x8x8xf32>
    %205 = vector.shape_cast %204 : vector<1x8x8xf32> to vector<8x8xf32>
    %206 = vector.extract_strided_slice %199 {offsets = [3, 0, 0], sizes = [1, 8, 8], strides = [1, 1, 1]} : vector<4x8x8xf32> to vector<1x8x8xf32>
    %207 = vector.shape_cast %206 : vector<1x8x8xf32> to vector<8x8xf32>
    %208 = tpu.concatenate %201, %203, %205, %207 in 1 : vector<8x8xf32>, vector<8x8xf32>, vector<8x8xf32>, vector<8x8xf32> -> vector<8x32xf32>
    %209 = vector.extract_strided_slice %150 {offsets = [8, 0], sizes = [8, 32], strides = [1, 1]} : vector<16x32xf32> to vector<8x32xf32>
    %210 = vector.extract_strided_slice %155 {offsets = [8, 0], sizes = [8, 32], strides = [1, 1]} : vector<16x64xf32> to vector<8x32xf32>
    %211 = vector.extract_strided_slice %155 {offsets = [8, 32], sizes = [8, 32], strides = [1, 1]} : vector<16x64xf32> to vector<8x32xf32>
    %212 = vector.extract_strided_slice %209 {offsets = [0, 0], sizes = [8, 8], strides = [1, 1]} : vector<8x32xf32> to vector<8x8xf32>
    %213 = vector.extract_strided_slice %209 {offsets = [0, 8], sizes = [8, 8], strides = [1, 1]} : vector<8x32xf32> to vector<8x8xf32>
    %214 = vector.extract_strided_slice %209 {offsets = [0, 16], sizes = [8, 8], strides = [1, 1]} : vector<8x32xf32> to vector<8x8xf32>
    %215 = vector.extract_strided_slice %209 {offsets = [0, 24], sizes = [8, 8], strides = [1, 1]} : vector<8x32xf32> to vector<8x8xf32>
    %216 = vector.shape_cast %212 : vector<8x8xf32> to vector<1x8x8xf32>
    %217 = vector.shape_cast %213 : vector<8x8xf32> to vector<1x8x8xf32>
    %218 = vector.shape_cast %214 : vector<8x8xf32> to vector<1x8x8xf32>
    %219 = vector.shape_cast %215 : vector<8x8xf32> to vector<1x8x8xf32>
    %220 = tpu.concatenate %216, %217, %218, %219 in 0 : vector<1x8x8xf32>, vector<1x8x8xf32>, vector<1x8x8xf32>, vector<1x8x8xf32> -> vector<4x8x8xf32>
    %221 = vector.extract_strided_slice %210 {offsets = [0, 0], sizes = [8, 8], strides = [1, 1]} : vector<8x32xf32> to vector<8x8xf32>
    %222 = vector.extract_strided_slice %210 {offsets = [0, 8], sizes = [8, 8], strides = [1, 1]} : vector<8x32xf32> to vector<8x8xf32>
    %223 = vector.extract_strided_slice %210 {offsets = [0, 16], sizes = [8, 8], strides = [1, 1]} : vector<8x32xf32> to vector<8x8xf32>
    %224 = vector.extract_strided_slice %210 {offsets = [0, 24], sizes = [8, 8], strides = [1, 1]} : vector<8x32xf32> to vector<8x8xf32>
    %225 = vector.shape_cast %221 : vector<8x8xf32> to vector<1x8x8xf32>
    %226 = vector.shape_cast %222 : vector<8x8xf32> to vector<1x8x8xf32>
    %227 = vector.shape_cast %223 : vector<8x8xf32> to vector<1x8x8xf32>
    %228 = vector.shape_cast %224 : vector<8x8xf32> to vector<1x8x8xf32>
    %229 = tpu.concatenate %225, %226, %227, %228 in 0 : vector<1x8x8xf32>, vector<1x8x8xf32>, vector<1x8x8xf32>, vector<1x8x8xf32> -> vector<4x8x8xf32>
    %230 = vector.extract_strided_slice %211 {offsets = [0, 0], sizes = [8, 8], strides = [1, 1]} : vector<8x32xf32> to vector<8x8xf32>
    %231 = vector.extract_strided_slice %211 {offsets = [0, 8], sizes = [8, 8], strides = [1, 1]} : vector<8x32xf32> to vector<8x8xf32>
    %232 = vector.extract_strided_slice %211 {offsets = [0, 16], sizes = [8, 8], strides = [1, 1]} : vector<8x32xf32> to vector<8x8xf32>
    %233 = vector.extract_strided_slice %211 {offsets = [0, 24], sizes = [8, 8], strides = [1, 1]} : vector<8x32xf32> to vector<8x8xf32>
    %234 = vector.shape_cast %230 : vector<8x8xf32> to vector<1x8x8xf32>
    %235 = vector.shape_cast %231 : vector<8x8xf32> to vector<1x8x8xf32>
    %236 = vector.shape_cast %232 : vector<8x8xf32> to vector<1x8x8xf32>
    %237 = vector.shape_cast %233 : vector<8x8xf32> to vector<1x8x8xf32>
    %238 = tpu.concatenate %234, %235, %236, %237 in 0 : vector<1x8x8xf32>, vector<1x8x8xf32>, vector<1x8x8xf32>, vector<1x8x8xf32> -> vector<4x8x8xf32>
    "tpu.trace_start"() <{level = 10 : i32, message = "hqd,hkd->hqk"}> : () -> ()
    %cst_39 = arith.constant dense<0.000000e+00> : vector<4x8x8xf32>
    %239 = tpu.matmul %220, %229, %cst_39 {dimension_numbers = #tpu.dot_dimension_numbers<[2], [2], [1], [1], [0, 0, 0, 1, 1, 1], [0], [0]>} : vector<4x8x8xf32>, vector<4x8x8xf32>, vector<4x8x8xf32> -> vector<4x8x8xf32>
    "tpu.trace_stop"() : () -> ()
    %240 = vector.shape_cast %3 : vector<8x8xf32> to vector<1x8x8xf32>
    %241 = vector.broadcast %240 : vector<1x8x8xf32> to vector<4x8x8xf32>
    %242 = arith.addf %239, %241 : vector<4x8x8xf32>
    %cst_40 = arith.constant dense<0xFF800000> : vector<4x8xf32>
    %243 = vector.multi_reduction <maximumf>, %242, %cst_40 [2] : vector<4x8x8xf32> to vector<4x8xf32>
    %244 = vector.shape_cast %243 : vector<4x8xf32> to vector<4x8x1xf32>
    %245 = vector.broadcast %244 : vector<4x8x1xf32> to vector<4x8x8xf32>
    %246 = arith.subf %242, %245 : vector<4x8x8xf32>
    %247 = math.exp %246 : vector<4x8x8xf32>
    %cst_41 = arith.constant dense<0.000000e+00> : vector<4x8xf32>
    %248 = vector.multi_reduction <add>, %247, %cst_41 [2] : vector<4x8x8xf32> to vector<4x8xf32>
    %249 = vector.shape_cast %248 : vector<4x8xf32> to vector<4x8x1xf32>
    %250 = vector.broadcast %249 : vector<4x8x1xf32> to vector<4x8x8xf32>
    %251 = arith.divf %247, %250 : vector<4x8x8xf32>
    "tpu.trace_start"() <{level = 10 : i32, message = "hqk,hkd->hqd"}> : () -> ()
    %cst_42 = arith.constant dense<0.000000e+00> : vector<4x8x8xf32>
    %252 = tpu.matmul %251, %238, %cst_42 {dimension_numbers = #tpu.dot_dimension_numbers<[2], [1], [1], [2], [0, 0, 0, 1, 1, 2], [0], [0]>} : vector<4x8x8xf32>, vector<4x8x8xf32>, vector<4x8x8xf32> -> vector<4x8x8xf32>
    "tpu.trace_stop"() : () -> ()
    %253 = vector.extract_strided_slice %252 {offsets = [0, 0, 0], sizes = [1, 8, 8], strides = [1, 1, 1]} : vector<4x8x8xf32> to vector<1x8x8xf32>
    %254 = vector.shape_cast %253 : vector<1x8x8xf32> to vector<8x8xf32>
    %255 = vector.extract_strided_slice %252 {offsets = [1, 0, 0], sizes = [1, 8, 8], strides = [1, 1, 1]} : vector<4x8x8xf32> to vector<1x8x8xf32>
    %256 = vector.shape_cast %255 : vector<1x8x8xf32> to vector<8x8xf32>
    %257 = vector.extract_strided_slice %252 {offsets = [2, 0, 0], sizes = [1, 8, 8], strides = [1, 1, 1]} : vector<4x8x8xf32> to vector<1x8x8xf32>
    %258 = vector.shape_cast %257 : vector<1x8x8xf32> to vector<8x8xf32>
    %259 = vector.extract_strided_slice %252 {offsets = [3, 0, 0], sizes = [1, 8, 8], strides = [1, 1, 1]} : vector<4x8x8xf32> to vector<1x8x8xf32>
    %260 = vector.shape_cast %259 : vector<1x8x8xf32> to vector<8x8xf32>
    %261 = tpu.concatenate %254, %256, %258, %260 in 1 : vector<8x8xf32>, vector<8x8xf32>, vector<8x8xf32>, vector<8x8xf32> -> vector<8x32xf32>
    %262 = tpu.concatenate %208, %261 in 0 : vector<8x32xf32>, vector<8x32xf32> -> vector<16x32xf32>
    %c128 = arith.constant 128 : index
    %c0_43 = arith.constant 0 : index
    %263 = vector.load %arg4[%c128, %c0_43] : memref<256x128xf32, #tpu.memory_space<vmem>>, vector<32x32xf32>
    %cst_44 = arith.constant dense<0.000000e+00> : vector<16x32xf32>
    %264 = tpu.matmul %262, %263, %cst_44 {dimension_numbers = #tpu.dot_dimension_numbers<[1], [0], [0], [1], [0, 0, 1, 1], [], []>} : vector<16x32xf32>, vector<32x32xf32>, vector<16x32xf32> -> vector<16x32xf32>
    %c4 = arith.constant 4 : index
    %c0_45 = arith.constant 0 : index
    %265 = vector.load %arg5[%c4, %c0_45] : memref<16x128xf32, #tpu.memory_space<vmem>>, vector<1x32xf32>
    %266 = vector.broadcast %265 : vector<1x32xf32> to vector<16x32xf32>
    %267 = arith.addf %264, %266 : vector<16x32xf32>
    %c9 = arith.constant 9 : index
    %c0_46 = arith.constant 0 : index
    %268 = vector.load %arg5[%c9, %c0_46] : memref<16x128xf32, #tpu.memory_space<vmem>>, vector<1x32xf32>
    %c10 = arith.constant 10 : index
    %c0_47 = arith.constant 0 : index
    %269 = vector.load %arg5[%c10, %c0_47] : memref<16x128xf32, #tpu.memory_space<vmem>>, vector<1x32xf32>
    %270 = arith.addf %145, %267 : vector<16x32xf32>
    %cst_48 = arith.constant dense<0.000000e+00> : vector<16xf32>
    %271 = vector.multi_reduction <add>, %270, %cst_48 [1] : vector<16x32xf32> to vector<16xf32>
    %272 = vector.shape_cast %271 : vector<16xf32> to vector<16x1xf32>
    %cst_49 = arith.constant 3.200000e+01 : f32
    %273 = vector.broadcast %cst_49 : f32 to vector<16x1xf32>
    %274 = arith.divf %272, %273 : vector<16x1xf32>
    %275 = vector.broadcast %274 : vector<16x1xf32> to vector<16x32xf32>
    %276 = arith.subf %270, %275 : vector<16x32xf32>
    %277 = arith.mulf %276, %276 : vector<16x32xf32>
    %cst_50 = arith.constant dense<0.000000e+00> : vector<16xf32>
    %278 = vector.multi_reduction <add>, %277, %cst_50 [1] : vector<16x32xf32> to vector<16xf32>
    %279 = vector.shape_cast %278 : vector<16xf32> to vector<16x1xf32>
    %cst_51 = arith.constant 3.200000e+01 : f32
    %280 = vector.broadcast %cst_51 : f32 to vector<16x1xf32>
    %281 = arith.divf %279, %280 : vector<16x1xf32>
    %282 = vector.broadcast %274 : vector<16x1xf32> to vector<16x32xf32>
    %283 = arith.subf %270, %282 : vector<16x32xf32>
    %cst_52 = arith.constant 9.99999974E-6 : f32
    %284 = vector.broadcast %cst_52 : f32 to vector<16x1xf32>
    %285 = arith.addf %281, %284 : vector<16x1xf32>
    %286 = math.rsqrt %285 : vector<16x1xf32>
    %287 = vector.broadcast %286 : vector<16x1xf32> to vector<16x32xf32>
    %288 = arith.mulf %283, %287 : vector<16x32xf32>
    %289 = vector.broadcast %268 : vector<1x32xf32> to vector<16x32xf32>
    %290 = arith.mulf %288, %289 : vector<16x32xf32>
    %291 = vector.broadcast %269 : vector<1x32xf32> to vector<16x32xf32>
    %292 = arith.addf %290, %291 : vector<16x32xf32>
    %c160 = arith.constant 160 : index
    %c0_53 = arith.constant 0 : index
    %293 = vector.load %arg4[%c160, %c0_53] : memref<256x128xf32, #tpu.memory_space<vmem>>, vector<32x64xf32>
    %cst_54 = arith.constant dense<0.000000e+00> : vector<16x64xf32>
    %294 = tpu.matmul %292, %293, %cst_54 {dimension_numbers = #tpu.dot_dimension_numbers<[1], [0], [0], [1], [0, 0, 1, 1], [], []>} : vector<16x32xf32>, vector<32x64xf32>, vector<16x64xf32> -> vector<16x64xf32>
    %c5 = arith.constant 5 : index
    %c0_55 = arith.constant 0 : index
    %295 = vector.load %arg5[%c5, %c0_55] : memref<16x128xf32, #tpu.memory_space<vmem>>, vector<1x64xf32>
    %296 = vector.broadcast %295 : vector<1x64xf32> to vector<16x64xf32>
    %297 = arith.addf %294, %296 : vector<16x64xf32>
    %cst_56 = arith.constant 0.000000e+00 : f32
    %298 = vector.broadcast %cst_56 : f32 to vector<16x64xf32>
    %299 = arith.maximumf %297, %298 : vector<16x64xf32>
    %c192 = arith.constant 192 : index
    %c0_57 = arith.constant 0 : index
    %300 = vector.load %arg4[%c192, %c0_57] : memref<256x128xf32, #tpu.memory_space<vmem>>, vector<64x32xf32>
    %cst_58 = arith.constant dense<0.000000e+00> : vector<16x32xf32>
    %301 = tpu.matmul %299, %300, %cst_58 {dimension_numbers = #tpu.dot_dimension_numbers<[1], [0], [0], [1], [0, 0, 1, 1], [], []>} : vector<16x64xf32>, vector<64x32xf32>, vector<16x32xf32> -> vector<16x32xf32>
    %c6 = arith.constant 6 : index
    %c0_59 = arith.constant 0 : index
    %302 = vector.load %arg5[%c6, %c0_59] : memref<16x128xf32, #tpu.memory_space<vmem>>, vector<1x32xf32>
    %303 = vector.broadcast %302 : vector<1x32xf32> to vector<16x32xf32>
    %304 = arith.addf %301, %303 : vector<16x32xf32>
    %c11 = arith.constant 11 : index
    %c0_60 = arith.constant 0 : index
    %305 = vector.load %arg5[%c11, %c0_60] : memref<16x128xf32, #tpu.memory_space<vmem>>, vector<1x32xf32>
    %c12 = arith.constant 12 : index
    %c0_61 = arith.constant 0 : index
    %306 = vector.load %arg5[%c12, %c0_61] : memref<16x128xf32, #tpu.memory_space<vmem>>, vector<1x32xf32>
    %307 = arith.addf %292, %304 : vector<16x32xf32>
    %cst_62 = arith.constant dense<0.000000e+00> : vector<16xf32>
    %308 = vector.multi_reduction <add>, %307, %cst_62 [1] : vector<16x32xf32> to vector<16xf32>
    %309 = vector.shape_cast %308 : vector<16xf32> to vector<16x1xf32>
    %cst_63 = arith.constant 3.200000e+01 : f32
    %310 = vector.broadcast %cst_63 : f32 to vector<16x1xf32>
    %311 = arith.divf %309, %310 : vector<16x1xf32>
    %312 = vector.broadcast %311 : vector<16x1xf32> to vector<16x32xf32>
    %313 = arith.subf %307, %312 : vector<16x32xf32>
    %314 = arith.mulf %313, %313 : vector<16x32xf32>
    %cst_64 = arith.constant dense<0.000000e+00> : vector<16xf32>
    %315 = vector.multi_reduction <add>, %314, %cst_64 [1] : vector<16x32xf32> to vector<16xf32>
    %316 = vector.shape_cast %315 : vector<16xf32> to vector<16x1xf32>
    %cst_65 = arith.constant 3.200000e+01 : f32
    %317 = vector.broadcast %cst_65 : f32 to vector<16x1xf32>
    %318 = arith.divf %316, %317 : vector<16x1xf32>
    %319 = vector.broadcast %311 : vector<16x1xf32> to vector<16x32xf32>
    %320 = arith.subf %307, %319 : vector<16x32xf32>
    %cst_66 = arith.constant 9.99999974E-6 : f32
    %321 = vector.broadcast %cst_66 : f32 to vector<16x1xf32>
    %322 = arith.addf %318, %321 : vector<16x1xf32>
    %323 = math.rsqrt %322 : vector<16x1xf32>
    %324 = vector.broadcast %323 : vector<16x1xf32> to vector<16x32xf32>
    %325 = arith.mulf %320, %324 : vector<16x32xf32>
    %326 = vector.broadcast %305 : vector<1x32xf32> to vector<16x32xf32>
    %327 = arith.mulf %325, %326 : vector<16x32xf32>
    %328 = vector.broadcast %306 : vector<1x32xf32> to vector<16x32xf32>
    %329 = arith.addf %327, %328 : vector<16x32xf32>
    %c0_67 = arith.constant 0 : index
    %c0_68 = arith.constant 0 : index
    %330 = vector.load %arg6[%c0_67, %c0_68] : memref<16x32xf32, #tpu.memory_space<vmem>>, vector<16x32xf32>
    tpu.vector_store %arg6[%c0_67, %c0_68], %329 {strides = array<i32>} : memref<16x32xf32, #tpu.memory_space<vmem>>, vector<16x32xf32>,
    return
  }
}

</mosaic_0001>

<bundles_post_ra>
// kernel: decoder_layer.1
= control target key start
LH: loop header
LB: loop body
LE: loop exit
PB: predicated region body
PF: predicated region fallthrough
CT: control target
= control target key end

     0   :  { %11 = vsyncpa [#allocation3], 0  ;;  %s4679_s0 = inlined_call_operand.hbm [shape: f32[16,32], index: 0, kind: input, shape index: {}]   ;;  %s4680_s1 = inlined_call_operand.hbm [shape: f32[16,32], index: 1, kind: input, shape index: {}]   ;;  %s4681_s2 = inlined_call_operand.hbm [shape: f32[8,8], index: 2, kind: input, shape index: {}]   ;;  %s4682_s3 = inlined_call_operand.vmem [shape: f32[8,8], index: 3, kind: input, shape index: {}]   ;;  %s4683_s4 = inlined_call_operand.hbm [shape: f32[256,128], index: 4, kind: input, shape index: {}]   ;;  %s4684_s5 = inlined_call_operand.hbm [shape: f32[16,128], index: 5, kind: input, shape index: {}]   ;;  %s4685_s6 = inlined_call_operand.hbm [shape: f32[16,32], index: 6, kind: output, shape index: {}]  }
   0x1   :  { %12 = vsyncpa [#allocation6], 0 }
   0x2   :  { %13 = vsyncpa [#allocation9], 0 }
   0x3   :  { %14 = vsyncpa [#allocation4], 0  ;;  %s4230_s21 = smov [#allocation5]   ;;  %s4231_s23 = smov [#allocation8]  }
   0x4   :  { %s32_s22 = sshll.u32 %s4230_s21, 4  ;;  %s56_s24 = sshll.u32 %s4231_s23, 4  ;;  %s33_s22 = int_to_ptr.vmem [resolvable:$true] %s32_s22  ;;  %s57_s24 = int_to_ptr.vmem [resolvable:$true] %s56_s24 }
   0x5   :  { %s4110_s25 = scalar_lea.vmem %s33_s22, 256  ;;  %p4115_p1 = scmp.lt.s32.totalorder %s33_s22, %s33_s22 }
   0x6   :  { %p4111_p0 = scmp.ne.s32.totalorder %s33_s22, %s4110_s25  ;;  %p4116_p2 = scmp.lt.s32.totalorder %s4110_s25, %s4110_s25 }
   0x8   :  { %p4117_p3 = por %p4116_p2, %p4115_p1 }
   0xa   :  { %p4118_p4 = pnand %p4117_p3, %p4111_p0 }
   0xc   :  { %4121 = shalt.err (!%p4118_p4)
}
   0xd   :  { %s4232_s26 = smov 128   ;;  %s4233_s27 = smov 8  }
   0xe   :  { %38 = dma.hbm_to_vmem [thread:$0]  %s4680_s1, 256, %s33_s22, [#allocation6], %s4232_s26, %s4232_s26, %s4233_s27  }
   0xf   :  { %s4130_s30 = scalar_lea.vmem %s57_s24, 4096  ;;  %p4135_p6 = scmp.lt.s32.totalorder %s57_s24, %s57_s24 }
  0x10   :  { %p4131_p5 = scmp.ne.s32.totalorder %s57_s24, %s4130_s30  ;;  %p4136_p7 = scmp.lt.s32.totalorder %s4130_s30, %s4130_s30 }
  0x12   :  { %p4137_p8 = por %p4136_p7, %p4135_p6 }
  0x14   :  { %p4138_p9 = pnand %p4137_p8, %p4131_p5 }
  0x16   :  { %4141 = shalt.err (!%p4138_p9)
}
  0x17   :  { %62 = dma.hbm_to_vmem [thread:$0]  %s4683_s4, 4096, %s57_s24, [#allocation9], %s4232_s26, %s4232_s26, %s4233_s27  }
  0x18   :  { %s4234_s9 = smov [#allocation2]   ;;  %s4235_s11 = smov [#allocation7]  }
  0x19   :  { %s20_s10 = sshll.u32 %s4234_s9, 4  ;;  %s45_s12 = sshll.u32 %s4235_s11, 4  ;;  %s21_s10 = int_to_ptr.vmem [resolvable:$true] %s20_s10  ;;  %s46_s12 = int_to_ptr.vmem [resolvable:$true] %s45_s12 }
  0x1a   :  { %s4150_s1 = scalar_lea.vmem %s21_s10, 256  ;;  %p4155_p11 = scmp.lt.s32.totalorder %s21_s10, %s21_s10 }
  0x1b   :  { %p4151_p10 = scmp.ne.s32.totalorder %s21_s10, %s4150_s1  ;;  %p4156_p12 = scmp.lt.s32.totalorder %s4150_s1, %s4150_s1 }
  0x1d   :  { %p4157_p13 = por %p4156_p12, %p4155_p11 }
  0x1f   :  { %p4158_p0 = pnand %p4157_p13, %p4151_p10 }
  0x21   :  { %4161 = shalt.err (!%p4158_p0)
}
  0x22   :  { %26 = dma.hbm_to_vmem [thread:$0]  %s4679_s0, 256, %s21_s10, [#allocation3], %s4232_s26, %s4232_s26, %s4233_s27  }
  0x23   :  { %s4170_s4 = scalar_lea.vmem %s46_s12, 128  ;;  %p4175_p2 = scmp.lt.s32.totalorder %s46_s12, %s46_s12 }
  0x24   :  { %p4171_p1 = scmp.ne.s32.totalorder %s46_s12, %s4170_s4  ;;  %p4176_p3 = scmp.lt.s32.totalorder %s4170_s4, %s4170_s4 }
  0x26   :  { %p4177_p4 = por %p4176_p3, %p4175_p2 }
  0x28   :  { %p4178_p5 = pnand %p4177_p4, %p4171_p1 }
  0x2a   :  { %4181 = shalt.err (!%p4178_p5)
}
  0x2b   :  { %48 = dma.hbm_to_vmem [thread:$0]  %s4681_s2, 128, %s46_s12, [#allocation6]  }
  0x2c   :  { %s4236_s17 = smov [#allocation10]  }
  0x2d   :  { %s68_s18 = sshll.u32 %s4236_s17, 4  ;;  %s69_s18 = int_to_ptr.vmem [resolvable:$true] %s68_s18 }
  0x2e   :  { %s4190_s19 = scalar_lea.vmem %s69_s18, 256  ;;  %p4195_p7 = scmp.lt.s32.totalorder %s69_s18, %s69_s18 }
  0x2f   :  { %p4191_p6 = scmp.ne.s32.totalorder %s69_s18, %s4190_s19  ;;  %p4196_p8 = scmp.lt.s32.totalorder %s4190_s19, %s4190_s19 }
  0x31   :  { %p4197_p9 = por %p4196_p8, %p4195_p7 }
  0x33   :  { %p4198_p10 = pnand %p4197_p9, %p4191_p6 }
  0x35   :  { %4201 = shalt.err (!%p4198_p10)
}
  0x36   :  { %74 = dma.hbm_to_vmem [thread:$0]  %s4684_s5, 256, %s69_s18, [#allocation9], %s4232_s26, %s4232_s26, %s4233_s27  }
  0x37   :  { %4222 = dma.done.wait [#allocation3], 256  }
  0x38   :  { %4223 = vsyncadd [#allocation3], 4294967040 }
  0x39   :  { %4224 = dma.done.wait [#allocation6], 384  }
  0x3a   :  { %4225 = vsyncadd [#allocation6], 4294966912 }
  0x3b   :  { %4226 = dma.done.wait [#allocation9], 4352  }
  0x3c   :  { %4227 = vsyncadd [#allocation9], 4294962944  ;;  %vm105_vm0 = vcmask 261120   ;;  %v99_v0 = vld [vmem:[#allocation8 + $0x18] sm:$0xff]  ;;  %v98_v1 = vld [vmem:[#allocation8 + $0x10] sm:$0xff]  ;;  %v4237_v6 = vmov 0.0  }
  0x3d   :  { %3764 = vmatprep.subr.mxu1 %v99_v0  ;;  %v4309_v2 = vld [vmem:[#allocation2] sm:$0xff]  ;;  %v97_v3 = vld [vmem:[#allocation8 + $0x8] sm:$0xff]  ;;  %v96_v4 = vld [vmem:[#allocation8] sm:$0xff]  ;;  %3785 = vmatprep.subr.mxu0 %v4237_v6  ;;  %vm4238_vm1 = vmmov 0   ;;  %s4239_s2 = smov 104   ;;  %s4240_s5 = smov 120  }
  0x3e   :  { %3765 = vmatpush3.msra.mxu1 %v99_v0  ;;  %3772 = vmatprep.mubr.msk.f32.mxu1 %vm105_vm0, %v4309_v2  ;;  %v4313_v5 = vld [vmem:[#allocation2 + $0x8] sm:$0xff]  ;;  %s4241_s21 = smov 96   ;;  %s4242_s22 = smov 112   ;;  %vm196_vm2 = vcmask 64512   ;;  %v4352_v19 = vld [vmem:[#allocation7] sm:$0xff]  ;;  %vm860_vm3 = vcmask 130048  }
  0x3f   :  { %3766 = vmatprep.subr.mxu1 %v98_v1  ;;  %v3579_v7 = vld [vmem:[#allocation10] ss:$0 sm:$0xff]  ;;  %3787 = vmatprep.mubr.msk.f32.mxu0 %vm4238_vm1, %v4237_v6  ;;  %s4243_s23 = smov 64   ;;  %s4244_s24 = smov 16   ;;  %vm862_vm4 = vcmask 195584   ;;  %vm3434_vm5 = vcmask 523264  }
  0x40   :  { %3767 = vmatpush3.msra.mxu1 %v98_v1  ;;  %s4245_s25 = smov 24  }
  0x41   :  { %3768 = vmatprep.subr.mxu1 %v97_v3 }
  0x42   :  { %3769 = vmatpush3.msra.mxu1 %v97_v3 }
  0x43   :  { %3770 = vmatprep.subr.mxu1 %v96_v4 }
  0x44   :  { %3771 = vmatpush3.msra.mxu1 %v96_v4 }
  0x45   :  { %3773 = vmatmul.mubr.msk.f32.vlgmr.msra.gmra.mxu1 %vm105_vm0, %v4313_v5  ;;  %3775 = vmatprep.subr.mxu1 %v4237_v6 }
  0x46   :  { %3777 = vmatprep.mubr.msk.f32.mxu1 %vm4238_vm1, %v4237_v6 }
 0x105   :  { %v3774_v8 = vpop.f32.mrf.mxu1 }
 0x106   :  { %v4323_v9 = vadd.f32 %v3774_v8, %v3579_v7 }
 0x107   :  { %v178_v10 = vpop.f32.mrf.mxu1 }
 0x108   :  { %v179_v11 = vadd.f32 %v3579_v7, %v178_v10 }
 0x10a   :  { %192 = vrot.lane.b32.xlu1 %v179_v11, %s4239_s2  ;;  %188 = vrot.lane.b32.xlu0 %v179_v11, %s4240_s5 }
 0x10e   :  { %194 = vrot.lane.b32.xlu1 %v179_v11, %s4241_s21  ;;  %190 = vrot.lane.b32.xlu0 %v179_v11, %s4242_s22 }
 0x17c   :  { %v193_v12 = vpop.permute.xlu1 %192  ;;  %v189_v13 = vpop.permute.xlu0 %188 }
 0x17d   :  { %271 = vrot.lane.b32.xlu0 %v189_v13, %s4241_s21 }
 0x180   :  { %v195_v14 = vpop.permute.xlu1 %194  ;;  %v191_v15 = vpop.permute.xlu0 %190 }
 0x181   :  { %3776 = vmatpush3.xpose.msk.msra.mxu1 %vm196_vm2, %v195_v14  ;;  %423 = vrot.lane.b32.xlu0 %v193_v12, %s4241_s21 }
 0x182   :  { %347 = vrot.lane.b32.xlu1 %v191_v15, %s4241_s21  ;;  %3780 = vmatprep.subr.mxu1 %v4237_v6 }
 0x184   :  { %3778 = vmatmul.mubr.msk.f32.vlgmr.msra.gmra.mxu1 %vm196_vm2, %v179_v11 }
 0x185   :  { %3782 = vmatprep.mubr.msk.f32.mxu1 %vm4238_vm1, %v4237_v6 }
 0x1ef   :  { %v272_v16 = vpop.permute.xlu0 %271 }
 0x1f0   :  { %3781 = vmatpush3.xpose.msk.msra.mxu1 %vm196_vm2, %v272_v16 }
 0x1f1   :  { %3790 = vmatprep.subr.mxu1 %v4237_v6 }
 0x1f3   :  { %3783 = vmatmul.mubr.msk.f32.vlgmr.msra.gmra.mxu1 %vm196_vm2, %v189_v13  ;;  %v424_v17 = vpop.permute.xlu0 %423 }
 0x1f4   :  { %v348_v18 = vpop.permute.xlu1 %347  ;;  %3791 = vmatpush3.xpose.msk.msra.mxu1 %vm196_vm2, %v424_v17  ;;  %3792 = vmatprep.mubr.msk.f32.mxu1 %vm4238_vm1, %v4237_v6 }
 0x1f5   :  { %3786 = vmatpush3.xpose.msk.msra.mxu0 %vm196_vm2, %v348_v18  ;;  %3800 = vmatprep.subr.mxu1 %v4237_v6 }
 0x1f6   :  { %3795 = vmatprep.subr.mxu0 %v4237_v6 }
 0x1f7   :  { %3793 = vmatmul.mubr.msk.f32.vlgmr.msra.gmra.mxu1 %vm196_vm2, %v193_v12 }
 0x1f8   :  { %3788 = vmatmul.mubr.msk.f32.vlgmr.msra.gmra.mxu0 %vm196_vm2, %v191_v15  ;;  %3802 = vmatprep.mubr.msk.f32.mxu1 %vm4238_vm1, %v4237_v6 }
 0x1f9   :  { %3797 = vmatprep.mubr.msk.f32.mxu0 %vm4238_vm1, %v4237_v6 }
 0x244   :  { %v267_v20 = vpop.f32.mrf.mxu1 }
 0x245   :  { %v268_v21 = vadd.f32 %v267_v20, %v4352_v19 }
 0x246   :  { %v3779_v22 = vpop.f32.mrf.mxu1 }
 0x247   :  { %v499_v23 = vsel %vm196_vm2, %v268_v21, -inf }
 0x248   :  { %500 = vmax.xlane.f32.xlu1 %v499_v23 }
 0x2b3   :  { %v343_v24 = vpop.f32.mrf.mxu1 }
 0x2b4   :  { %v344_v25 = vadd.f32 %v343_v24, %v4352_v19 }
 0x2b5   :  { %v3784_v26 = vpop.f32.mrf.mxu1 }
 0x2b6   :  { %v502_v27 = vsel %vm196_vm2, %v344_v25, -inf }
 0x2b7   :  { %503 = vmax.xlane.f32.xlu0 %v502_v27  ;;  %v495_v28 = vpop.f32.mrf.mxu1 }
 0x2b8   :  { %v419_v29 = vpop.f32.mrf.mxu0  ;;  %v496_v30 = vadd.f32 %v495_v28, %v4352_v19 }
 0x2b9   :  { %v420_v31 = vadd.f32 %v419_v29, %v4352_v19  ;;  %v3794_v32 = vpop.f32.mrf.mxu1 }
 0x2ba   :  { %v3789_v33 = vpop.f32.mrf.mxu0  ;;  %v508_v34 = vsel %vm196_vm2, %v496_v30, -inf }
 0x2bb   :  { %v505_v35 = vsel %vm196_vm2, %v420_v31, -inf  ;;  %509 = vmax.xlane.f32.xlu1 %v508_v34 }
 0x2bc   :  { %506 = vmax.xlane.f32.xlu0 %v505_v35 }
 0x2cc   :  { %867 = vrot.lane.b32.xlu1 %v4323_v9, %s4242_s22 }
 0x2d0   :  { %869 = vrot.lane.b32.xlu1 %v4323_v9, %s4239_s2 }
 0x2d1   :  { %v501_v36 = vpop.xlane.xlu1 %500 }
 0x2d2   :  { %865 = vrot.lane.b32.xlu0 %v4323_v9, %s4240_s5  ;;  %v511_v37 = vsub.f32 %v268_v21, %v501_v36 }
 0x2d4   :  { %543 = vrot.lane.b32.xlu1 %v179_v11, %s4243_s23  ;;  %v515_v38 = vmul.f32 1.442695, %v511_v37 }
 0x2d6   :  { %619 = vrot.lane.b32.xlu0 %v189_v13, %s4243_s23  ;;  %4026 = vpow2.f32 %v515_v38 }
 0x2d8   :  { %695 = vrot.lane.b32.xlu1 %v191_v15, %s4243_s23 }
 0x2dc   :  { %771 = vrot.lane.b32.xlu1 %v193_v12, %s4243_s23 }
 0x2e3   :  { %v4027_v39 = vpop.eup %4026 }
 0x2e4   :  { %v523_v40 = vsel %vm196_vm2, %v4027_v39, 0.0 }
 0x2f5   :  { %524 = vadd.xlane.f32.xlu0 %v523_v40 }
 0x340   :  { %v504_v41 = vpop.xlane.xlu0 %503 }
 0x341   :  { %v512_v42 = vsub.f32 %v344_v25, %v504_v41 }
 0x343   :  { %v517_v43 = vmul.f32 1.442695, %v512_v42 }
 0x344   :  { %v510_v44 = vpop.xlane.xlu1 %509 }
 0x345   :  { %4028 = vpow2.f32 %v517_v43  ;;  %v514_v45 = vsub.f32 %v496_v30, %v510_v44  ;;  %v507_v46 = vpop.xlane.xlu0 %506 }
 0x346   :  { %v513_v47 = vsub.f32 %v420_v31, %v507_v46 }
 0x347   :  { %v521_v48 = vmul.f32 1.442695, %v514_v45 }
 0x348   :  { %v519_v49 = vmul.f32 1.442695, %v513_v47  ;;  %v4373_v50 = vpop.permute.xlu1 %867 }
 0x349   :  { %v4375_v51 = vpop.permute.xlu0 %865 }
 0x34a   :  { %4030 = vpow2.f32 %v519_v49 }
 0x34b   :  { %4032 = vpow2.f32 %v521_v48 }
 0x34c   :  { %v4377_v52 = vpop.permute.xlu1 %869 }
 0x34d   :  { %v620_v53 = vpop.permute.xlu0 %619 }
 0x34e   :  { %3801 = vmatpush3.msra.mxu1 %v620_v53 }
 0x34f   :  { %3810 = vmatprep.subr.mxu1 %v4237_v6 }
 0x350   :  { %v544_v54 = vpop.permute.xlu1 %543 }
 0x351   :  { %3796 = vmatpush3.msra.mxu0 %v544_v54 }
 0x352   :  { %v4029_v55 = vpop.eup %4028  ;;  %3805 = vmatprep.subr.mxu0 %v4237_v6 }
 0x353   :  { %v526_v56 = vsel %vm196_vm2, %v4029_v55, 0.0 }
 0x354   :  { %527 = vadd.xlane.f32.xlu1 %v526_v56  ;;  %v696_v0 = vpop.permute.xlu1 %695 }
 0x357   :  { %v4031_v57 = vpop.eup %4030 }
 0x358   :  { %v529_v58 = vsel %vm196_vm2, %v4031_v57, 0.0  ;;  %v4033_v59 = vpop.eup %4032  ;;  %v772_v1 = vpop.permute.xlu1 %771 }
 0x359   :  { %530 = vadd.xlane.f32.xlu0 %v529_v58  ;;  %v532_v60 = vsel %vm196_vm2, %v4033_v59, 0.0 }
 0x35d   :  { %533 = vadd.xlane.f32.xlu0 %v532_v60 }
 0x365   :  { %947 = vrot.lane.b32.xlu1 %v4375_v51, %s4241_s21 }
 0x369   :  { %1099 = vrot.lane.b32.xlu1 %v4377_v52, %s4241_s21 }
 0x373   :  { %871 = vrot.lane.b32.xlu0 %v4323_v9, %s4241_s21 }
 0x377   :  { %1023 = vrot.lane.b32.xlu0 %v4373_v50, %s4241_s21 }
 0x37e   :  { %v525_v61 = vpop.xlane.xlu0 %524 }
 0x37f   :  { %4034 = vrcp.f32 %v525_v61 }
 0x38c   :  { %v4035_v62 = vpop.eup %4034 }
 0x38d   :  { %v536_v63 = vmul.f32 %v4035_v62, %v4027_v39 }
 0x38f   :  { %3798 = vmatmul.mubr.msk.f32.vlgmr.msra.gmra.mxu0 %vm196_vm2, %v536_v63 }
 0x390   :  { %3806 = vmatpush3.msra.mxu0 %v696_v0  ;;  %3807 = vmatprep.mubr.msk.f32.mxu0 %vm4238_vm1, %v4237_v6 }
 0x391   :  { %3815 = vmatprep.subr.mxu0 %v4237_v6 }
 0x3dd   :  { %v528_v3 = vpop.xlane.xlu1 %527 }
 0x3de   :  { %4036 = vrcp.f32 %v528_v3 }
 0x3e1   :  { %v948_v15 = vpop.permute.xlu1 %947 }
 0x3e2   :  { %v531_v4 = vpop.xlane.xlu0 %530 }
 0x3e3   :  { %4038 = vrcp.f32 %v531_v4 }
 0x3e5   :  { %v1100_v18 = vpop.permute.xlu1 %1099 }
 0x3e6   :  { %v534_v7 = vpop.xlane.xlu0 %533 }
 0x3e7   :  { %4040 = vrcp.f32 %v534_v7 }
 0x3ea   :  { %v872_v12 = vpop.permute.xlu0 %871 }
 0x3eb   :  { %v4037_v8 = vpop.eup %4036 }
 0x3ec   :  { %v538_v10 = vmul.f32 %v4037_v8, %v4029_v55 }
 0x3ee   :  { %3803 = vmatmul.mubr.msk.f32.vlgmr.msra.gmra.mxu1 %vm196_vm2, %v538_v10  ;;  %v1024_v17 = vpop.permute.xlu0 %1023 }
 0x3ef   :  { %3811 = vmatpush3.msra.mxu1 %v772_v1  ;;  %3812 = vmatprep.mubr.msk.f32.mxu1 %vm4238_vm1, %v4237_v6 }
 0x3f0   :  { %v4039_v11 = vpop.eup %4038  ;;  %3820 = vmatprep.subr.mxu1 %v4237_v6 }
 0x3f1   :  { %v540_v13 = vmul.f32 %v4039_v11, %v4031_v57 }
 0x3f3   :  { %3808 = vmatmul.mubr.msk.f32.vlgmr.msra.gmra.mxu0 %vm196_vm2, %v540_v13 }
 0x3f4   :  { %v4041_v14 = vpop.eup %4040  ;;  %3816 = vmatpush3.xpose.msk.msra.mxu0 %vm196_vm2, %v872_v12  ;;  %3817 = vmatprep.mubr.msk.f32.mxu0 %vm4238_vm1, %v4237_v6 }
 0x3f5   :  { %3825 = vmatprep.subr.mxu0 %v4237_v6  ;;  %v542_v16 = vmul.f32 %v4041_v14, %v4033_v59 }
 0x3f7   :  { %3813 = vmatmul.mubr.msk.f32.vlgmr.msra.gmra.mxu1 %vm196_vm2, %v542_v16  ;;  %3818 = vmatmul.mubr.msk.f32.vlgmr.msra.gmra.mxu0 %vm196_vm2, %v4323_v9 }
 0x3f8   :  { %3821 = vmatpush3.xpose.msk.msra.mxu1 %vm196_vm2, %v948_v15  ;;  %3826 = vmatpush3.xpose.msk.msra.mxu0 %vm196_vm2, %v1024_v17 }
 0x3f9   :  { %3822 = vmatprep.mubr.msk.f32.mxu1 %vm4238_vm1, %v4237_v6  ;;  %3827 = vmatprep.mubr.msk.f32.mxu0 %vm4238_vm1, %v4237_v6 }
 0x3fa   :  { %3830 = vmatprep.subr.mxu1 %v4237_v6  ;;  %3835 = vmatprep.subr.mxu0 %v4237_v6 }
 0x3fb   :  { %3823 = vmatmul.mubr.msk.f32.vlgmr.msra.gmra.mxu1 %vm196_vm2, %v4375_v51  ;;  %3828 = vmatmul.mubr.msk.f32.vlgmr.msra.gmra.mxu0 %vm196_vm2, %v4373_v50 }
 0x3fc   :  { %3831 = vmatpush3.xpose.msk.msra.mxu1 %vm196_vm2, %v1100_v18  ;;  %3832 = vmatprep.mubr.msk.f32.mxu1 %vm4238_vm1, %v4237_v6 }
 0x3fd   :  { %3840 = vmatprep.subr.mxu1 %v4237_v6  ;;  %3837 = vmatprep.mubr.msk.f32.mxu0 %vm4238_vm1, %v4237_v6 }
 0x3ff   :  { %3833 = vmatmul.mubr.msk.f32.vlgmr.msra.gmra.mxu1 %vm196_vm2, %v4377_v52 }
 0x400   :  { %3842 = vmatprep.mubr.msk.f32.mxu1 %vm4238_vm1, %v4237_v6 }
 0x44f   :  { %v4430_v20 = vpop.f32.mrf.mxu0 }
 0x451   :  { %v3799_v21 = vpop.f32.mrf.mxu0 }
 0x4ae   :  { %v4432_v22 = vpop.f32.mrf.mxu1 }
 0x4b0   :  { %v3804_v23 = vpop.f32.mrf.mxu1 }
 0x4b3   :  { %v767_v24 = vpop.f32.mrf.mxu0 }
 0x4b5   :  { %v3809_v25 = vpop.f32.mrf.mxu0 }
 0x4b6   :  { %v1541_v25 = vld [vmem:[#allocation8 + $0x38] sm:$0xff] }
 0x4b7   :  { %v843_v26 = vpop.f32.mrf.mxu1  ;;  %v943_v27 = vpop.f32.mrf.mxu0 }
 0x4b8   :  { %v944_v28 = vadd.f32 %v943_v27, %v4352_v19  ;;  %v1539_v27 = vld [vmem:[#allocation8 + $0x28] sm:$0xff] }
 0x4b9   :  { %v3814_v29 = vpop.f32.mrf.mxu1  ;;  %v3819_v30 = vpop.f32.mrf.mxu0 }
 0x4ba   :  { %v1175_v31 = vsel %vm196_vm2, %v944_v28, -inf }
 0x4bb   :  { %v1019_v32 = vpop.f32.mrf.mxu1  ;;  %1176 = vmax.xlane.f32.xlu0 %v1175_v31  ;;  %v1095_v33 = vpop.f32.mrf.mxu0 }
 0x4bc   :  { %v1020_v34 = vadd.f32 %v1019_v32, %v4352_v19  ;;  %v1096_v35 = vadd.f32 %v1095_v33, %v4352_v19 }
 0x4bd   :  { %v3824_v36 = vpop.f32.mrf.mxu1  ;;  %v3829_v37 = vpop.f32.mrf.mxu0 }
 0x4be   :  { %v1178_v38 = vsel %vm196_vm2, %v1020_v34, -inf  ;;  %v1181_v39 = vsel %vm196_vm2, %v1096_v35, -inf }
 0x4bf   :  { %1179 = vmax.xlane.f32.xlu1 %v1178_v38  ;;  %v1171_v40 = vpop.f32.mrf.mxu1  ;;  %1182 = vmax.xlane.f32.xlu0 %v1181_v39 }
 0x4c0   :  { %v1172_v41 = vadd.f32 %v1171_v40, %v4352_v19 }
 0x4c1   :  { %v3834_v42 = vpop.f32.mrf.mxu1 }
 0x4c2   :  { %v1184_v43 = vsel %vm196_vm2, %v1172_v41, -inf }
 0x4c3   :  { %1185 = vmax.xlane.f32.xlu0 %v1184_v43  ;;  %v3606_v43 = vld [vmem:[#allocation10 + $0x1] ss:$0 sm:$0xff] }
 0x4d0   :  { %1219 = vrot.lane.b32.xlu1 %v4323_v9, %s4243_s23 }
 0x544   :  { %v1177_v44 = vpop.xlane.xlu0 %1176 }
 0x545   :  { %v1187_v45 = vsub.f32 %v944_v28, %v1177_v44  ;;  %v1538_v28 = vld [vmem:[#allocation8 + $0x20] sm:$0xff] }
 0x547   :  { %v1191_v46 = vmul.f32 1.442695, %v1187_v45 }
 0x548   :  { %v1180_v47 = vpop.xlane.xlu1 %1179  ;;  %v1183_v48 = vpop.xlane.xlu0 %1182 }
 0x549   :  { %4042 = vpow2.f32 %v1191_v46  ;;  %v1188_v49 = vsub.f32 %v1020_v34, %v1180_v47  ;;  %v1189_v53 = vsub.f32 %v1096_v35, %v1183_v48 }
 0x54b   :  { %v1193_v54 = vmul.f32 1.442695, %v1188_v49  ;;  %v1195_v55 = vmul.f32 1.442695, %v1189_v53 }
 0x54c   :  { %v1220_v56 = vpop.permute.xlu1 %1219  ;;  %v1186_v57 = vpop.xlane.xlu0 %1185 }
 0x54d   :  { %4044 = vpow2.f32 %v1193_v54  ;;  %v1190_v19 = vsub.f32 %v1172_v41, %v1186_v57  ;;  %3836 = vmatpush3.msra.mxu0 %v1220_v56 }
 0x54e   :  { %4046 = vpow2.f32 %v1195_v55  ;;  %3845 = vmatprep.subr.mxu0 %v4237_v6 }
 0x54f   :  { %v1197_v58 = vmul.f32 1.442695, %v1190_v19 }
 0x551   :  { %4048 = vpow2.f32 %v1197_v58 }
 0x556   :  { %v4043_v9 = vpop.eup %4042 }
 0x557   :  { %v1199_v59 = vsel %vm196_vm2, %v4043_v9, 0.0 }
 0x558   :  { %1200 = vadd.xlane.f32.xlu1 %v1199_v59 }
 0x55a   :  { %v4045_v60 = vpop.eup %4044 }
 0x55b   :  { %v4047_v61 = vpop.eup %4046  ;;  %v1202_v62 = vsel %vm196_vm2, %v4045_v60, 0.0 }
 0x55c   :  { %1203 = vadd.xlane.f32.xlu0 %v1202_v62  ;;  %v1205_v63 = vsel %vm196_vm2, %v4047_v61, 0.0  ;;  %v1764_v62 = vld [vmem:[#allocation8 + $0x78] sm:$0xff] }
 0x55d   :  { %1206 = vadd.xlane.f32.xlu1 %v1205_v63  ;;  %v1762_v63 = vld [vmem:[#allocation8 + $0x68] sm:$0xff] }
 0x55e   :  { %v4049_v0 = vpop.eup %4048 }
 0x55f   :  { %v1208_v1 = vsel %vm196_vm2, %v4049_v0, 0.0 }
 0x560   :  { %1209 = vadd.xlane.f32.xlu0 %v1208_v1  ;;  %v1674_v1 = vld [vmem:[#allocation8 + $0x58] sm:$0xff] }
 0x56e   :  { %1371 = vrot.lane.b32.xlu1 %v4373_v50, %s4243_s23 }
 0x572   :  { %1447 = vrot.lane.b32.xlu1 %v4377_v52, %s4243_s23 }
 0x576   :  { %852 = vrot.lane.b32.xlu1 %v767_v24, %s4244_s24  ;;  %1295 = vrot.lane.b32.xlu0 %v4375_v51, %s4243_s23 }
 0x57a   :  { %856 = vrot.lane.b32.xlu1 %v843_v26, %s4245_s25  ;;  %848 = vrot.lane.b32.xlu0 %v4432_v22, %s4233_s27  ;;  %v1540_v26 = vld [vmem:[#allocation8 + $0x30] sm:$0xff] }
 0x5e1   :  { %v1201_v3 = vpop.xlane.xlu1 %1200 }
 0x5e2   :  { %4050 = vrcp.f32 %v1201_v3  ;;  %v1761_v3 = vld [vmem:[#allocation8 + $0x60] sm:$0xff] }
 0x5e5   :  { %v1204_v4 = vpop.xlane.xlu0 %1203 }
 0x5e6   :  { %v1207_v7 = vpop.xlane.xlu1 %1206  ;;  %4052 = vrcp.f32 %v1204_v4  ;;  %v1673_v4 = vld [vmem:[#allocation8 + $0x50] sm:$0xff] }
 0x5e7   :  { %4054 = vrcp.f32 %v1207_v7  ;;  %v93_v7 = vld [vmem:[#allocation5 + $0x8] sm:$0xff] }
 0x5e9   :  { %v1210_v50 = vpop.xlane.xlu0 %1209 }
 0x5ea   :  { %v1372_v52 = vpop.permute.xlu1 %1371  ;;  %4056 = vrcp.f32 %v1210_v50  ;;  %v1672_v50 = vld [vmem:[#allocation8 + $0x48] sm:$0xff] }
 0x5ed   :  { %v1296_v8 = vpop.permute.xlu0 %1295 }
 0x5ee   :  { %v1448_v10 = vpop.permute.xlu1 %1447  ;;  %3841 = vmatpush3.msra.mxu1 %v1296_v8 }
 0x5ef   :  { %v4051_v11 = vpop.eup %4050  ;;  %3850 = vmatprep.subr.mxu1 %v4237_v6 }
 0x5f0   :  { %v1212_v51 = vmul.f32 %v4051_v11, %v4043_v9 }
 0x5f1   :  { %v849_v12 = vpop.permute.xlu0 %848 }
 0x5f2   :  { %v853_v13 = vpop.permute.xlu1 %852  ;;  %3838 = vmatmul.mubr.msk.f32.vlgmr.msra.gmra.mxu0 %vm196_vm2, %v1212_v51  ;;  %v859_v15 = vsel %vm196_vm2, %v4430_v20, %v849_v12 }
 0x5f3   :  { %v4053_v14 = vpop.eup %4052  ;;  %3846 = vmatpush3.msra.mxu0 %v1372_v52  ;;  %3847 = vmatprep.mubr.msk.f32.mxu0 %vm4238_vm1, %v4237_v6  ;;  %v861_v22 = vsel %vm860_vm3, %v859_v15, %v853_v13  ;;  %v1671_v52 = vld [vmem:[#allocation8 + $0x40] sm:$0xff] }
 0x5f4   :  { %v4055_v16 = vpop.eup %4054  ;;  %v1214_v17 = vmul.f32 %v4053_v14, %v4045_v60  ;;  %3855 = vmatprep.subr.mxu0 %v1541_v25  ;;  %v3609_v15 = vld [vmem:[#allocation10 + $0x7] ss:$0 sm:$0xff] }
 0x5f5   :  { %v1216_v18 = vmul.f32 %v4055_v16, %v4047_v61 }
 0x5f6   :  { %v857_v21 = vpop.permute.xlu1 %856  ;;  %3843 = vmatmul.mubr.msk.f32.vlgmr.msra.gmra.mxu1 %vm196_vm2, %v1214_v17  ;;  %v3610_v17 = vld [vmem:[#allocation10 + $0x8] ss:$0 sm:$0xff] }
 0x5f7   :  { %v4057_v23 = vpop.eup %4056  ;;  %v863_v24 = vsel %vm862_vm4, %v861_v22, %v857_v21  ;;  %3848 = vmatmul.mubr.msk.f32.vlgmr.msra.gmra.mxu0 %vm196_vm2, %v1216_v18  ;;  %3851 = vmatpush3.msra.mxu1 %v1448_v10 }
 0x5f8   :  { %3863 = vmatprep.mubr.msk.f32.mxu0 %vm105_vm0, %v863_v24  ;;  %3852 = vmatprep.mubr.msk.f32.mxu1 %vm4238_vm1, %v4237_v6  ;;  %v1218_v20 = vmul.f32 %v4057_v23, %v4049_v0  ;;  %v92_v0 = vld [vmem:[#allocation5] sm:$0xff] }
 0x5f9   :  { %3856 = vmatpush3.msra.mxu0 %v1541_v25  ;;  %3866 = vmatprep.subr.mxu1 %v1674_v1 }
 0x5fa   :  { %3853 = vmatmul.mubr.msk.f32.vlgmr.msra.gmra.mxu1 %vm196_vm2, %v1218_v20  ;;  %3857 = vmatprep.subr.mxu0 %v1540_v26 }
 0x5fb   :  { %3858 = vmatpush3.msra.mxu0 %v1540_v26  ;;  %3867 = vmatpush3.msra.mxu1 %v1674_v1  ;;  %v3614_v26 = vld [vmem:[#allocation10 + $0x3] ss:$0 sm:$0xff] }
 0x5fc   :  { %3859 = vmatprep.subr.mxu0 %v1539_v27  ;;  %3868 = vmatprep.subr.mxu1 %v1673_v4 }
 0x5fd   :  { %3860 = vmatpush3.msra.mxu0 %v1539_v27  ;;  %3869 = vmatpush3.msra.mxu1 %v1673_v4 }
 0x5fe   :  { %3861 = vmatprep.subr.mxu0 %v1538_v28  ;;  %3870 = vmatprep.subr.mxu1 %v1672_v50 }
 0x5ff   :  { %3862 = vmatpush3.msra.mxu0 %v1538_v28  ;;  %3871 = vmatpush3.msra.mxu1 %v1672_v50 }
 0x600   :  { %3877 = vmatprep.subr.mxu0 %v1764_v62  ;;  %3872 = vmatprep.subr.mxu1 %v1671_v52 }
 0x601   :  { %3873 = vmatpush3.msra.mxu1 %v1671_v52 }
 0x602   :  { %3888 = vmatprep.subr.mxu1 %v4237_v6 }
 0x6b2   :  { %v1291_v29 = vpop.f32.mrf.mxu0 }
 0x6b4   :  { %v3839_v30 = vpop.f32.mrf.mxu0 }
 0x6b6   :  { %v1367_v31 = vpop.f32.mrf.mxu1 }
 0x6b7   :  { %v1443_v32 = vpop.f32.mrf.mxu0  ;;  %1524 = vrot.lane.b32.xlu0 %v1367_v31, %s4233_s27 }
 0x6b8   :  { %v3844_v33 = vpop.f32.mrf.mxu1 }
 0x6b9   :  { %v3849_v34 = vpop.f32.mrf.mxu0 }
 0x6ba   :  { %v1519_v35 = vpop.f32.mrf.mxu1 }
 0x6bb   :  { %1528 = vrot.lane.b32.xlu0 %v1443_v32, %s4244_s24  ;;  %1532 = vrot.lane.b32.xlu1 %v1519_v35, %s4245_s25  ;;  %v3611_v32 = vld [vmem:[#allocation10 + $0x2] ss:$0 sm:$0xff] }
 0x6bc   :  { %v3854_v36 = vpop.f32.mrf.mxu1 }
 0x729   :  { %v1525_v37 = vpop.permute.xlu0 %1524 }
 0x72a   :  { %v1535_v38 = vsel %vm196_vm2, %v1291_v29, %v1525_v37 }
 0x72d   :  { %v1533_v39 = vpop.permute.xlu1 %1532  ;;  %v1529_v40 = vpop.permute.xlu0 %1528 }
 0x72e   :  { %v1536_v41 = vsel %vm860_vm3, %v1535_v38, %v1529_v40 }
 0x72f   :  { %v1537_v42 = vsel %vm862_vm4, %v1536_v41, %v1533_v39  ;;  %v4535_v41 = vld [vmem:[%s4682_s3] sm:$0xff]  ;;  %s4246_s3 = smov [#allocation11]  }
 0x730   :  { %3864 = vmatmul.mubr.msk.f32.vlgmr.msra.gmra.mxu0 %vm105_vm0, %v1537_v42  ;;  %s3565_s30 = sshll.u32 %s4246_s3, 4  ;;  %s3566_s30 = int_to_ptr.vmem [resolvable:$true] %s3565_s30 }
 0x731   :  { %3878 = vmatpush3.msra.mxu0 %v1764_v62  ;;  %3885 = vmatprep.mubr.msk.f32.mxu0 %vm105_vm0, %v92_v0  ;;  %s4202_s7 = scalar_lea.vmem %s3566_s30, 256  ;;  %p4207_p12 = scmp.lt.s32.totalorder %s3566_s30, %s3566_s30 }
 0x732   :  { %p4203_p11 = scmp.ne.s32.totalorder %s3566_s30, %s4202_s7  ;;  %p4208_p13 = scmp.lt.s32.totalorder %s4202_s7, %s4202_s7 }
 0x734   :  { %p4209_p0 = por %p4208_p13, %p4207_p12 }
 0x736   :  { %p4210_p1 = pnand %p4209_p0, %p4203_p11 }
 0x7f0   :  { %v3865_v44 = vpop.f32.mrf.mxu0 }
 0x7f1   :  { %v1625_v45 = vadd.f32 %v3865_v44, %v3606_v43 }
 0x7f2   :  { %v1619_v46 = vpop.f32.mrf.mxu0 }
 0x7f3   :  { %v1620_v47 = vadd.f32 %v3606_v43, %v1619_v46  ;;  %v1631_v48 = vadd.f32 %v1625_v45, %v4313_v5 }
 0x7f5   :  { %v1635_v49 = vsel %vm105_vm0, %v1631_v48, 0.0  ;;  %v1630_v53 = vadd.f32 %v1620_v47, %v4309_v2  ;;  %v1763_v2 = vld [vmem:[#allocation8 + $0x70] sm:$0xff] }
 0x7f6   :  { %1636 = vadd.xlane.f32.xlu1 %v1635_v49  ;;  %3879 = vmatprep.subr.mxu0 %v1763_v2 }
 0x7f7   :  { %v1632_v54 = vsel %vm105_vm0, %v1630_v53, 0.0  ;;  %3880 = vmatpush3.msra.mxu0 %v1763_v2 }
 0x7f8   :  { %1633 = vadd.xlane.f32.xlu0 %v1632_v54  ;;  %3881 = vmatprep.subr.mxu0 %v1762_v63 }
 0x7f9   :  { %3882 = vmatpush3.msra.mxu0 %v1762_v63 }
 0x7fa   :  { %3883 = vmatprep.subr.mxu0 %v1761_v3 }
 0x7fb   :  { %3884 = vmatpush3.msra.mxu0 %v1761_v3 }
 0x7fc   :  { %3886 = vmatmul.mubr.msk.f32.vlgmr.msra.gmra.mxu0 %vm105_vm0, %v93_v7  ;;  %3898 = vmatprep.subr.mxu0 %v4237_v6 }
 0x7fd   :  { %3900 = vmatprep.mubr.msk.f32.mxu0 %vm4238_vm1, %v4237_v6 }
 0x87f   :  { %v1637_v55 = vpop.xlane.xlu1 %1636 }
 0x880   :  { %v1640_v56 = vmul.f32 0.03125, %v1637_v55 }
 0x881   :  { %v1634_v57 = vpop.xlane.xlu0 %1633 }
 0x882   :  { %v1639_v19 = vmul.f32 0.03125, %v1634_v57  ;;  %v1642_v58 = vsub.f32 %v1631_v48, %v1640_v56 }
 0x884   :  { %v1641_v9 = vsub.f32 %v1630_v53, %v1639_v19  ;;  %v1644_v61 = vmul.f32 %v1642_v58, %v1642_v58 }
 0x886   :  { %v1643_v59 = vmul.f32 %v1641_v9, %v1641_v9  ;;  %v1648_v5 = vsel %vm105_vm0, %v1644_v61, 0.0 }
 0x888   :  { %v1645_v60 = vsel %vm105_vm0, %v1643_v59, 0.0 }
 0x889   :  { %1646 = vadd.xlane.f32.xlu0 %v1645_v60 }
 0x88d   :  { %1649 = vadd.xlane.f32.xlu0 %v1648_v5 }
 0x8bc   :  { %v3887_v25 = vpop.f32.mrf.mxu0 }
 0x8bd   :  { %v4502_v27 = vadd.f32 %v3887_v25, %v3614_v26 }
 0x8be   :  { %v1842_v28 = vpop.f32.mrf.mxu0 }
 0x8bf   :  { %v1843_v29 = vadd.f32 %v3614_v26, %v1842_v28 }
 0x8c1   :  { %1859 = vrot.lane.b32.xlu1 %v1843_v29, %s4240_s5 }
 0x8c5   :  { %1861 = vrot.lane.b32.xlu1 %v1843_v29, %s4242_s22 }
 0x8c9   :  { %1863 = vrot.lane.b32.xlu1 %v1843_v29, %s4239_s2 }
 0x912   :  { %v1647_v8 = vpop.xlane.xlu0 %1646 }
 0x913   :  { %v1651_v10 = vmul.f32 0.03125, %v1647_v8 }
 0x915   :  { %v1653_v11 = vadd.f32 1e-05, %v1651_v10 }
 0x916   :  { %v1650_v51 = vpop.xlane.xlu0 %1649 }
 0x917   :  { %4058 = vrsqrt.f32 %v1653_v11  ;;  %v1652_v12 = vmul.f32 0.03125, %v1650_v51 }
 0x919   :  { %v1654_v13 = vadd.f32 1e-05, %v1652_v12 }
 0x91b   :  { %4060 = vrsqrt.f32 %v1654_v13 }
 0x924   :  { %v4059_v14 = vpop.eup %4058 }
 0x925   :  { %v1657_v16 = vmul.f32 %v4059_v14, %v1641_v9 }
 0x927   :  { %v1663_v18 = vmul.f32 %v3609_v15, %v1657_v16 }
 0x928   :  { %v4061_v21 = vpop.eup %4060 }
 0x929   :  { %v1658_v22 = vmul.f32 %v4061_v21, %v1642_v58  ;;  %v4492_v23 = vadd.f32 %v3610_v17, %v1663_v18 }
 0x92b   :  { %v1664_v24 = vmul.f32 %v3609_v15, %v1658_v22  ;;  %3874 = vmatprep.mubr.msk.f32.mxu1 %vm105_vm0, %v4492_v23 }
 0x92d   :  { %v4496_v20 = vadd.f32 %v3610_v17, %v1664_v24 }
 0x92f   :  { %3875 = vmatmul.mubr.msk.f32.vlgmr.msra.gmra.mxu1 %vm105_vm0, %v4496_v20 }
 0x930   :  { %3890 = vmatprep.mubr.msk.f32.mxu1 %vm4238_vm1, %v4237_v6  ;;  %3889 = vmatpush3.xpose.msk.msra.mxu1 %vm196_vm2, %v1843_v29 }
 0x931   :  { %3893 = vmatprep.subr.mxu1 %v4237_v6 }
 0x933   :  { %v1860_v30 = vpop.permute.xlu1 %1859 }
 0x937   :  { %v1862_v31 = vpop.permute.xlu1 %1861 }
 0x938   :  { %3899 = vmatpush3.xpose.msk.msra.mxu0 %vm196_vm2, %v1862_v31 }
 0x939   :  { %3908 = vmatprep.subr.mxu0 %v4237_v6 }
 0x93b   :  { %v1864_v37 = vpop.permute.xlu1 %1863 }
 0x9ef   :  { %v3876_v33 = vpop.f32.mrf.mxu1 }
 0x9f0   :  { %v4511_v34 = vadd.f32 %v3876_v33, %v3611_v32 }
 0x9f1   :  { %v1752_v35 = vpop.f32.mrf.mxu1 }
 0x9f2   :  { %v1753_v36 = vadd.f32 %v3611_v32, %v1752_v35 }
 0x9f4   :  { %1856 = vrot.lane.b32.xlu1 %v1753_v36, %s4239_s2  ;;  %1852 = vrot.lane.b32.xlu0 %v1753_v36, %s4240_s5 }
 0x9f5   :  { %3891 = vmatmul.mubr.msk.f32.vlgmr.msra.gmra.mxu1 %vm196_vm2, %v1753_v36 }
 0x9f6   :  { %3894 = vmatpush3.xpose.msk.msra.mxu1 %vm196_vm2, %v1860_v30  ;;  %3895 = vmatprep.mubr.msk.f32.mxu1 %vm4238_vm1, %v4237_v6 }
 0x9f7   :  { %3903 = vmatprep.subr.mxu1 %v4237_v6 }
 0x9f8   :  { %1854 = vrot.lane.b32.xlu0 %v1753_v36, %s4242_s22 }
 0xa66   :  { %v1853_v38 = vpop.permute.xlu0 %1852  ;;  %v1857_v39 = vpop.permute.xlu1 %1856 }
 0xa67   :  { %3896 = vmatmul.mubr.msk.f32.vlgmr.msra.gmra.mxu1 %vm196_vm2, %v1853_v38 }
 0xa68   :  { %3904 = vmatpush3.xpose.msk.msra.mxu1 %vm196_vm2, %v1864_v37  ;;  %3905 = vmatprep.mubr.msk.f32.mxu1 %vm4238_vm1, %v4237_v6 }
 0xa69   :  { %3913 = vmatprep.subr.mxu1 %v4237_v6 }
 0xa6a   :  { %v1855_v40 = vpop.permute.xlu0 %1854 }
 0xa6b   :  { %3901 = vmatmul.mubr.msk.f32.vlgmr.msra.gmra.mxu0 %vm196_vm2, %v1855_v40  ;;  %3906 = vmatmul.mubr.msk.f32.vlgmr.msra.gmra.mxu1 %vm196_vm2, %v1857_v39 }
 0xa6c   :  { %3910 = vmatprep.mubr.msk.f32.mxu0 %vm4238_vm1, %v4237_v6  ;;  %3915 = vmatprep.mubr.msk.f32.mxu1 %vm4238_vm1, %v4237_v6 }
 0xab5   :  { %v1935_v42 = vpop.f32.mrf.mxu1 }
 0xab6   :  { %v1936_v43 = vadd.f32 %v1935_v42, %v4535_v41 }
 0xab7   :  { %v3892_v44 = vpop.f32.mrf.mxu1 }
 0xab8   :  { %v2161_v45 = vsel %vm196_vm2, %v1936_v43, -inf }
 0xab9   :  { %2162 = vmax.xlane.f32.xlu0 %v2161_v45 }
 0xb27   :  { %v2009_v46 = vpop.f32.mrf.mxu1 }
 0xb28   :  { %v2010_v47 = vadd.f32 %v2009_v46, %v4535_v41 }
 0xb29   :  { %v3897_v48 = vpop.f32.mrf.mxu1 }
 0xb2a   :  { %v2164_v49 = vsel %vm196_vm2, %v2010_v47, -inf }
 0xb2b   :  { %v2083_v53 = vpop.f32.mrf.mxu0  ;;  %2165 = vmax.xlane.f32.xlu1 %v2164_v49  ;;  %v2157_v54 = vpop.f32.mrf.mxu1 }
 0xb2c   :  { %v2084_v55 = vadd.f32 %v2083_v53, %v4535_v41  ;;  %v2158_v19 = vadd.f32 %v2157_v54, %v4535_v41 }
 0xb2d   :  { %v3902_v56 = vpop.f32.mrf.mxu0  ;;  %v3907_v57 = vpop.f32.mrf.mxu1 }
 0xb2e   :  { %v2167_v58 = vsel %vm196_vm2, %v2084_v55, -inf  ;;  %v2170_v9 = vsel %vm196_vm2, %v2158_v19, -inf }
 0xb2f   :  { %2168 = vmax.xlane.f32.xlu0 %v2167_v58 }
 0xb33   :  { %2171 = vmax.xlane.f32.xlu0 %v2170_v9 }
 0xb3c   :  { %2205 = vrot.lane.b32.xlu1 %v1843_v29, %s4241_s21 }
 0xb40   :  { %2357 = vrot.lane.b32.xlu1 %v1862_v31, %s4241_s21 }
 0xb42   :  { %v2163_v59 = vpop.xlane.xlu0 %2162 }
 0xb43   :  { %v2173_v60 = vsub.f32 %v1936_v43, %v2163_v59 }
 0xb44   :  { %2433 = vrot.lane.b32.xlu1 %v1864_v37, %s4241_s21 }
 0xb45   :  { %v2177_v61 = vmul.f32 1.442695, %v2173_v60 }
 0xb47   :  { %4062 = vpow2.f32 %v2177_v61 }
 0xb48   :  { %2525 = vrot.lane.b32.xlu1 %v4511_v34, %s4240_s5 }
 0xb49   :  { %2281 = vrot.lane.b32.xlu0 %v1860_v30, %s4241_s21 }
 0xb4d   :  { %2532 = vrot.lane.b32.xlu0 %v4502_v27, %s4240_s5 }
 0xb54   :  { %v4063_v5 = vpop.eup %4062 }
 0xb55   :  { %v2185_v62 = vsel %vm196_vm2, %v4063_v5, 0.0 }
 0xb6c   :  { %2186 = vadd.xlane.f32.xlu1 %v2185_v62 }
 0xbb4   :  { %v2166_v2 = vpop.xlane.xlu1 %2165 }
 0xbb5   :  { %v2174_v63 = vsub.f32 %v2010_v47, %v2166_v2 }
 0xbb7   :  { %v2179_v0 = vmul.f32 1.442695, %v2174_v63 }
 0xbb8   :  { %v2169_v1 = vpop.xlane.xlu0 %2168  ;;  %v2206_v3 = vpop.permute.xlu1 %2205 }
 0xbb9   :  { %4064 = vpow2.f32 %v2179_v0  ;;  %v2175_v4 = vsub.f32 %v2084_v55, %v2169_v1  ;;  %3909 = vmatpush3.msra.mxu0 %v2206_v3 }
 0xbba   :  { %3918 = vmatprep.subr.mxu0 %v4237_v6 }
 0xbbb   :  { %v2181_v7 = vmul.f32 1.442695, %v2175_v4 }
 0xbbc   :  { %v2172_v50 = vpop.xlane.xlu0 %2171  ;;  %v2358_v16 = vpop.permute.xlu1 %2357 }
 0xbbd   :  { %4066 = vpow2.f32 %v2181_v7  ;;  %v2176_v52 = vsub.f32 %v2158_v19, %v2172_v50 }
 0xbbf   :  { %v2183_v8 = vmul.f32 1.442695, %v2176_v52 }
 0xbc0   :  { %v2282_v10 = vpop.permute.xlu0 %2281  ;;  %v2434_v17 = vpop.permute.xlu1 %2433 }
 0xbc1   :  { %4068 = vpow2.f32 %v2183_v8  ;;  %3914 = vmatpush3.msra.mxu1 %v2282_v10 }
 0xbc2   :  { %3923 = vmatprep.subr.mxu1 %v4237_v6 }
 0xbc4   :  { %v2526_v18 = vpop.permute.xlu1 %2525  ;;  %v4571_v25 = vpop.permute.xlu0 %2532 }
 0xbc6   :  { %v4065_v11 = vpop.eup %4064 }
 0xbc7   :  { %v2188_v51 = vsel %vm196_vm2, %v4065_v11, 0.0 }
 0xbc8   :  { %2189 = vadd.xlane.f32.xlu0 %v2188_v51 }
 0xbca   :  { %v4067_v12 = vpop.eup %4066 }
 0xbcb   :  { %v2191_v13 = vsel %vm196_vm2, %v4067_v12, 0.0 }
 0xbcc   :  { %2192 = vadd.xlane.f32.xlu1 %v2191_v13 }
 0xbce   :  { %v4069_v14 = vpop.eup %4068 }
 0xbcf   :  { %v2194_v15 = vsel %vm196_vm2, %v4069_v14, 0.0 }
 0xbd0   :  { %2195 = vadd.xlane.f32.xlu0 %v2194_v15 }
 0xbdd   :  { %2536 = vrot.lane.b32.xlu1 %v4502_v27, %s4239_s2 }
 0xbe1   :  { %2529 = vrot.lane.b32.xlu1 %v4511_v34, %s4239_s2 }
 0xbe6   :  { %2534 = vrot.lane.b32.xlu0 %v4502_v27, %s4242_s22 }
 0xbea   :  { %2527 = vrot.lane.b32.xlu0 %v4511_v34, %s4242_s22 }
 0xbf5   :  { %v2187_v21 = vpop.xlane.xlu1 %2186 }
 0xbf6   :  { %4070 = vrcp.f32 %v2187_v21 }
 0xc03   :  { %v4071_v22 = vpop.eup %4070 }
 0xc04   :  { %v2198_v24 = vmul.f32 %v4071_v22, %v4063_v5 }
 0xc06   :  { %3911 = vmatmul.mubr.msk.f32.vlgmr.msra.gmra.mxu0 %vm196_vm2, %v2198_v24 }
 0xc07   :  { %3919 = vmatpush3.msra.mxu0 %v2358_v16  ;;  %3920 = vmatprep.mubr.msk.f32.mxu0 %vm4238_vm1, %v4237_v6 }
 0xc08   :  { %3928 = vmatprep.subr.mxu0 %v4237_v6 }
 0xc51   :  { %v2190_v26 = vpop.xlane.xlu0 %2189 }
 0xc52   :  { %4072 = vrcp.f32 %v2190_v26 }
 0xc55   :  { %v2193_v28 = vpop.xlane.xlu1 %2192 }
 0xc56   :  { %4074 = vrcp.f32 %v2193_v28 }
 0xc59   :  { %v2196_v29 = vpop.xlane.xlu0 %2195  ;;  %v4588_v38 = vpop.permute.xlu1 %2536 }
 0xc5a   :  { %4076 = vrcp.f32 %v2196_v29 }
 0xc5d   :  { %v4578_v36 = vpop.permute.xlu0 %2534 }
 0xc5f   :  { %v4073_v30 = vpop.eup %4072 }
 0xc60   :  { %v2200_v31 = vmul.f32 %v4073_v30, %v4065_v11 }
 0xc61   :  { %v2528_v39 = vpop.permute.xlu0 %2527 }
 0xc62   :  { %3916 = vmatmul.mubr.msk.f32.vlgmr.msra.gmra.mxu1 %vm196_vm2, %v2200_v31 }
 0xc63   :  { %v4075_v32 = vpop.eup %4074  ;;  %3924 = vmatpush3.msra.mxu1 %v2434_v17  ;;  %3925 = vmatprep.mubr.msk.f32.mxu1 %vm4238_vm1, %v4237_v6 }
 0xc64   :  { %v2202_v33 = vmul.f32 %v4075_v32, %v4067_v12  ;;  %3933 = vmatprep.subr.mxu1 %v4237_v6 }
 0xc66   :  { %3921 = vmatmul.mubr.msk.f32.vlgmr.msra.gmra.mxu0 %vm196_vm2, %v2202_v33 }
 0xc67   :  { %v4077_v35 = vpop.eup %4076  ;;  %3929 = vmatpush3.xpose.msk.msra.mxu0 %vm196_vm2, %v4502_v27  ;;  %3930 = vmatprep.mubr.msk.f32.mxu0 %vm4238_vm1, %v4237_v6 }
 0xc68   :  { %3938 = vmatprep.subr.mxu0 %v4237_v6  ;;  %v2204_v37 = vmul.f32 %v4077_v35, %v4069_v14 }
 0xc6a   :  { %3926 = vmatmul.mubr.msk.f32.vlgmr.msra.gmra.mxu1 %vm196_vm2, %v2204_v37  ;;  %3931 = vmatmul.mubr.msk.f32.vlgmr.msra.gmra.mxu0 %vm196_vm2, %v4511_v34  ;;  %v2530_v34 = vpop.permute.xlu1 %2529 }
 0xc6b   :  { %3934 = vmatpush3.xpose.msk.msra.mxu1 %vm196_vm2, %v4571_v25  ;;  %3939 = vmatpush3.xpose.msk.msra.mxu0 %vm196_vm2, %v4578_v36 }
 0xc6c   :  { %3935 = vmatprep.mubr.msk.f32.mxu1 %vm4238_vm1, %v4237_v6  ;;  %3940 = vmatprep.mubr.msk.f32.mxu0 %vm4238_vm1, %v4237_v6 }
 0xc6d   :  { %3943 = vmatprep.subr.mxu1 %v4237_v6  ;;  %3948 = vmatprep.subr.mxu0 %v4237_v6 }
 0xc6e   :  { %3936 = vmatmul.mubr.msk.f32.vlgmr.msra.gmra.mxu1 %vm196_vm2, %v2526_v18  ;;  %3941 = vmatmul.mubr.msk.f32.vlgmr.msra.gmra.mxu0 %vm196_vm2, %v2528_v39 }
 0xc6f   :  { %3944 = vmatpush3.xpose.msk.msra.mxu1 %vm196_vm2, %v4588_v38  ;;  %3945 = vmatprep.mubr.msk.f32.mxu1 %vm4238_vm1, %v4237_v6 }
 0xc70   :  { %3953 = vmatprep.subr.mxu1 %v4237_v6  ;;  %3950 = vmatprep.mubr.msk.f32.mxu0 %vm4238_vm1, %v4237_v6 }
 0xc72   :  { %3946 = vmatmul.mubr.msk.f32.vlgmr.msra.gmra.mxu1 %vm196_vm2, %v2530_v34 }
 0xc73   :  { %3955 = vmatprep.mubr.msk.f32.mxu1 %vm4238_vm1, %v4237_v6 }
 0xcc6   :  { %v4612_v40 = vpop.f32.mrf.mxu0 }
 0xcc8   :  { %v3912_v42 = vpop.f32.mrf.mxu0 }
 0xd22   :  { %v2353_v43 = vpop.f32.mrf.mxu1 }
 0xd24   :  { %v3917_v44 = vpop.f32.mrf.mxu1 }
 0xd26   :  { %v2429_v45 = vpop.f32.mrf.mxu0 }
 0xd28   :  { %v3922_v46 = vpop.f32.mrf.mxu0 }
 0xd29   :  { %v3200_v46 = vld [vmem:[#allocation8 + $0x98] sm:$0xff] }
 0xd2a   :  { %v2505_v47 = vpop.f32.mrf.mxu1  ;;  %v2608_v48 = vpop.f32.mrf.mxu0 }
 0xd2b   :  { %v2609_v49 = vadd.f32 %v2608_v48, %v4535_v41  ;;  %v3198_v48 = vld [vmem:[#allocation8 + $0x88] sm:$0xff] }
 0xd2c   :  { %v3927_v53 = vpop.f32.mrf.mxu1  ;;  %v3932_v54 = vpop.f32.mrf.mxu0 }
 0xd2d   :  { %v2834_v55 = vsel %vm196_vm2, %v2609_v49, -inf }
 0xd2e   :  { %2835 = vmax.xlane.f32.xlu0 %v2834_v55  ;;  %v2682_v56 = vpop.f32.mrf.mxu1  ;;  %v2756_v57 = vpop.f32.mrf.mxu0 }
 0xd2f   :  { %v2683_v19 = vadd.f32 %v2682_v56, %v4535_v41  ;;  %v2757_v58 = vadd.f32 %v2756_v57, %v4535_v41 }
 0xd30   :  { %v3937_v9 = vpop.f32.mrf.mxu1  ;;  %v3942_v59 = vpop.f32.mrf.mxu0 }
 0xd31   :  { %v2840_v60 = vsel %vm196_vm2, %v2757_v58, -inf  ;;  %v2837_v61 = vsel %vm196_vm2, %v2683_v19, -inf }
 0xd32   :  { %2841 = vmax.xlane.f32.xlu0 %v2840_v60  ;;  %2838 = vmax.xlane.f32.xlu1 %v2837_v61  ;;  %v2830_v5 = vpop.f32.mrf.mxu1 }
 0xd33   :  { %v2831_v62 = vadd.f32 %v2830_v5, %v4535_v41 }
 0xd34   :  { %v3947_v2 = vpop.f32.mrf.mxu1 }
 0xd35   :  { %v2843_v63 = vsel %vm196_vm2, %v2831_v62, -inf  ;;  %v3641_v2 = vld [vmem:[#allocation10 + $0x4] ss:$0 sm:$0xff] }
 0xd36   :  { %2844 = vmax.xlane.f32.xlu0 %v2843_v63 }
 0xd43   :  { %2878 = vrot.lane.b32.xlu1 %v4502_v27, %s4241_s21 }
 0xdb7   :  { %v2836_v0 = vpop.xlane.xlu0 %2835 }
 0xdb8   :  { %v2846_v1 = vsub.f32 %v2609_v49, %v2836_v0  ;;  %v3197_v49 = vld [vmem:[#allocation8 + $0x80] sm:$0xff] }
 0xdba   :  { %v2850_v3 = vmul.f32 1.442695, %v2846_v1 }
 0xdbb   :  { %v2842_v4 = vpop.xlane.xlu0 %2841  ;;  %v2839_v7 = vpop.xlane.xlu1 %2838 }
 0xdbc   :  { %4078 = vpow2.f32 %v2850_v3  ;;  %v2848_v50 = vsub.f32 %v2757_v58, %v2842_v4  ;;  %v2847_v52 = vsub.f32 %v2683_v19, %v2839_v7 }
 0xdbe   :  { %v2854_v8 = vmul.f32 1.442695, %v2848_v50  ;;  %v2852_v10 = vmul.f32 1.442695, %v2847_v52 }
 0xdbf   :  { %v2879_v11 = vpop.permute.xlu1 %2878  ;;  %v2845_v51 = vpop.xlane.xlu0 %2844 }
 0xdc0   :  { %4080 = vpow2.f32 %v2854_v8  ;;  %v2849_v41 = vsub.f32 %v2831_v62, %v2845_v51  ;;  %3949 = vmatpush3.msra.mxu0 %v2879_v11 }
 0xdc1   :  { %4082 = vpow2.f32 %v2852_v10  ;;  %3958 = vmatprep.subr.mxu0 %v4237_v6 }
 0xdc2   :  { %v2856_v12 = vmul.f32 1.442695, %v2849_v41 }
 0xdc4   :  { %4084 = vpow2.f32 %v2856_v12 }
 0xdc9   :  { %v4079_v27 = vpop.eup %4078 }
 0xdca   :  { %v2858_v13 = vsel %vm196_vm2, %v4079_v27, 0.0 }
 0xdcb   :  { %2859 = vadd.xlane.f32.xlu1 %v2858_v13 }
 0xdcd   :  { %v4081_v14 = vpop.eup %4080 }
 0xdce   :  { %v4083_v15 = vpop.eup %4082  ;;  %v2864_v16 = vsel %vm196_vm2, %v4081_v14, 0.0 }
 0xdcf   :  { %2865 = vadd.xlane.f32.xlu1 %v2864_v16  ;;  %v2861_v17 = vsel %vm196_vm2, %v4083_v15, 0.0  ;;  %v3330_v16 = vld [vmem:[#allocation8 + $0xa8] sm:$0xff] }
 0xdd0   :  { %2862 = vadd.xlane.f32.xlu0 %v2861_v17  ;;  %v3329_v17 = vld [vmem:[#allocation8 + $0xa0] sm:$0xff] }
 0xdd1   :  { %v4085_v18 = vpop.eup %4084 }
 0xdd2   :  { %v2867_v21 = vsel %vm196_vm2, %v4085_v18, 0.0 }
 0xdd4   :  { %2868 = vadd.xlane.f32.xlu0 %v2867_v21  ;;  %v3427_v21 = vld [vmem:[#allocation8 + $0xf0] sm:$0xff] }
 0xde0   :  { %3030 = vrot.lane.b32.xlu1 %v4578_v36, %s4241_s21 }
 0xde4   :  { %3106 = vrot.lane.b32.xlu1 %v4588_v38, %s4241_s21 }
 0xde8   :  { %2514 = vrot.lane.b32.xlu1 %v2429_v45, %s4244_s24 }
 0xdea   :  { %2954 = vrot.lane.b32.xlu0 %v4571_v25, %s4241_s21 }
 0xdec   :  { %2518 = vrot.lane.b32.xlu1 %v2505_v47, %s4245_s25  ;;  %v3199_v47 = vld [vmem:[#allocation8 + $0x90] sm:$0xff] }
 0xdee   :  { %2510 = vrot.lane.b32.xlu0 %v2353_v43, %s4233_s27 }
 0xe54   :  { %v2860_v22 = vpop.xlane.xlu1 %2859 }
 0xe55   :  { %4086 = vrcp.f32 %v2860_v22  ;;  %v3426_v22 = vld [vmem:[#allocation8 + $0xe8] sm:$0xff] }
 0xe58   :  { %v2866_v24 = vpop.xlane.xlu1 %2865 }
 0xe59   :  { %4088 = vrcp.f32 %v2866_v24  ;;  %v2863_v26 = vpop.xlane.xlu0 %2862  ;;  %v3425_v24 = vld [vmem:[#allocation8 + $0xe0] sm:$0xff] }
 0xe5a   :  { %4090 = vrcp.f32 %v2863_v26 }
 0xe5c   :  { %v3031_v28 = vpop.permute.xlu1 %3030 }
 0xe5d   :  { %v2869_v29 = vpop.xlane.xlu0 %2868 }
 0xe5e   :  { %4092 = vrcp.f32 %v2869_v29 }
 0xe60   :  { %v3107_v30 = vpop.permute.xlu1 %3106 }
 0xe61   :  { %v2955_v31 = vpop.permute.xlu0 %2954 }
 0xe62   :  { %v4087_v32 = vpop.eup %4086  ;;  %3954 = vmatpush3.msra.mxu1 %v2955_v31 }
 0xe63   :  { %v2871_v33 = vmul.f32 %v4087_v32, %v4079_v27  ;;  %3963 = vmatprep.subr.mxu1 %v4237_v6 }
 0xe64   :  { %v2515_v25 = vpop.permute.xlu1 %2514 }
 0xe65   :  { %v2511_v35 = vpop.permute.xlu0 %2510  ;;  %3951 = vmatmul.mubr.msk.f32.vlgmr.msra.gmra.mxu0 %vm196_vm2, %v2871_v33 }
 0xe66   :  { %v4089_v36 = vpop.eup %4088  ;;  %v2521_v37 = vsel %vm196_vm2, %v4612_v40, %v2511_v35  ;;  %3959 = vmatpush3.msra.mxu0 %v3031_v28  ;;  %3960 = vmatprep.mubr.msk.f32.mxu0 %vm4238_vm1, %v4237_v6 }
 0xe67   :  { %v4091_v38 = vpop.eup %4090  ;;  %v2875_v39 = vmul.f32 %v4089_v36, %v4081_v14  ;;  %v2522_v42 = vsel %vm860_vm3, %v2521_v37, %v2515_v25  ;;  %3968 = vmatprep.subr.mxu0 %v3200_v46  ;;  %v3644_v25 = vld [vmem:[#allocation10 + $0x9] ss:$0 sm:$0xff]  ;;  %v3645_v36 = vld [vmem:[#allocation10 + $0xa] ss:$0 sm:$0xff] }
 0xe68   :  { %v2519_v34 = vpop.permute.xlu1 %2518  ;;  %v2873_v43 = vmul.f32 %v4091_v38, %v4083_v15  ;;  %v3332_v15 = vld [vmem:[#allocation8 + $0xb8] sm:$0xff] }
 0xe69   :  { %v2523_v44 = vsel %vm862_vm4, %v2522_v42, %v2519_v34  ;;  %3961 = vmatmul.mubr.msk.f32.vlgmr.msra.gmra.mxu0 %vm196_vm2, %v2875_v39 }
 0xe6a   :  { %3956 = vmatmul.mubr.msk.f32.vlgmr.msra.gmra.mxu1 %vm196_vm2, %v2873_v43  ;;  %3976 = vmatprep.mubr.msk.f32.mxu0 %vm105_vm0, %v2523_v44  ;;  %v3424_v44 = vld [vmem:[#allocation8 + $0xd8] sm:$0xff] }
 0xe6b   :  { %v4093_v45 = vpop.eup %4092  ;;  %3964 = vmatpush3.msra.mxu1 %v3107_v30  ;;  %3965 = vmatprep.mubr.msk.f32.mxu1 %vm4238_vm1, %v4237_v6 }
 0xe6c   :  { %v2877_v40 = vmul.f32 %v4093_v45, %v4085_v18  ;;  %3969 = vmatpush3.msra.mxu0 %v3200_v46  ;;  %3979 = vmatprep.subr.mxu1 %v3332_v15  ;;  %v3428_v18 = vld [vmem:[#allocation8 + $0xf8] sm:$0xff]  ;;  %v3423_v45 = vld [vmem:[#allocation8 + $0xd0] sm:$0xff]  ;;  %v3421_v46 = vld [vmem:[#allocation8 + $0xc0] sm:$0xff] }
 0xe6d   :  { %3970 = vmatprep.subr.mxu0 %v3199_v47 }
 0xe6e   :  { %3966 = vmatmul.mubr.msk.f32.vlgmr.msra.gmra.mxu1 %vm196_vm2, %v2877_v40  ;;  %3971 = vmatpush3.msra.mxu0 %v3199_v47  ;;  %v3422_v40 = vld [vmem:[#allocation8 + $0xc8] sm:$0xff]  ;;  %v3646_v47 = vld [vmem:[#allocation10 + $0x5] ss:$0 sm:$0xff] }
 0xe6f   :  { %3972 = vmatprep.subr.mxu0 %v3198_v48  ;;  %3980 = vmatpush3.msra.mxu1 %v3332_v15  ;;  %v3653_v15 = vld [vmem:[#allocation10 + $0xc] ss:$0 sm:$0xff] }
 0xe70   :  { %3973 = vmatpush3.msra.mxu0 %v3198_v48 }
 0xe71   :  { %3974 = vmatprep.subr.mxu0 %v3197_v49 }
 0xe72   :  { %3975 = vmatpush3.msra.mxu0 %v3197_v49 }
 0xe73   :  { %3990 = vmatprep.subr.mxu0 %v3428_v18 }
 0xf25   :  { %v2950_v53 = vpop.f32.mrf.mxu0 }
 0xf27   :  { %v3952_v54 = vpop.f32.mrf.mxu0 }
 0xf29   :  { %v3102_v55 = vpop.f32.mrf.mxu0 }
 0xf2a   :  { %v3026_v56 = vpop.f32.mrf.mxu1 }
 0xf2b   :  { %3183 = vrot.lane.b32.xlu0 %v3026_v56, %s4233_s27  ;;  %v3962_v6 = vpop.f32.mrf.mxu0 }
 0xf2c   :  { %v3957_v57 = vpop.f32.mrf.mxu1  ;;  %v3649_v6 = vld [vmem:[#allocation10 + $0x6] ss:$0 sm:$0xff] }
 0xf2e   :  { %v3178_v19 = vpop.f32.mrf.mxu1 }
 0xf2f   :  { %3187 = vrot.lane.b32.xlu0 %v3102_v55, %s4244_s24  ;;  %3191 = vrot.lane.b32.xlu1 %v3178_v19, %s4245_s25 }
 0xf30   :  { %v3967_v58 = vpop.f32.mrf.mxu1 }
 0xf9d   :  { %v3184_v9 = vpop.permute.xlu0 %3183 }
 0xf9e   :  { %v3194_v59 = vsel %vm196_vm2, %v2950_v53, %v3184_v9 }
 0xfa1   :  { %v3188_v60 = vpop.permute.xlu0 %3187  ;;  %v3192_v61 = vpop.permute.xlu1 %3191 }
 0xfa2   :  { %v3195_v5 = vsel %vm860_vm3, %v3194_v59, %v3188_v60 }
 0xfa3   :  { %v3196_v62 = vsel %vm862_vm4, %v3195_v5, %v3192_v61 }
 0xfa4   :  { %3977 = vmatmul.mubr.msk.f32.vlgmr.msra.gmra.mxu0 %vm105_vm0, %v3196_v62 }
 0xfa5   :  { %3991 = vmatpush3.msra.mxu0 %v3428_v18 }
 0xfa6   :  { %3992 = vmatprep.subr.mxu0 %v3427_v21 }
 0xfa7   :  { %3993 = vmatpush3.msra.mxu0 %v3427_v21 }
 0xfa8   :  { %3994 = vmatprep.subr.mxu0 %v3426_v22 }
 0xfa9   :  { %3995 = vmatpush3.msra.mxu0 %v3426_v22 }
 0xfaa   :  { %3996 = vmatprep.subr.mxu0 %v3425_v24 }
 0xfab   :  { %3997 = vmatpush3.msra.mxu0 %v3425_v24 }
 0xfac   :  { %3998 = vmatprep.subr.mxu0 %v3424_v44 }
 0xfad   :  { %3999 = vmatpush3.msra.mxu0 %v3424_v44 }
 0xfae   :  { %4000 = vmatprep.subr.mxu0 %v3423_v45 }
 0xfaf   :  { %4001 = vmatpush3.msra.mxu0 %v3423_v45 }
 0xfb0   :  { %4002 = vmatprep.subr.mxu0 %v3422_v40 }
 0xfb1   :  { %4003 = vmatpush3.msra.mxu0 %v3422_v40 }
 0xfb2   :  { %4004 = vmatprep.subr.mxu0 %v3421_v46 }
 0xfb3   :  { %4005 = vmatpush3.msra.mxu0 %v3421_v46 }
0x1064   :  { %v3978_v63 = vpop.f32.mrf.mxu0 }
0x1065   :  { %v3284_v0 = vadd.f32 %v3978_v63, %v3641_v2 }
0x1066   :  { %v3278_v1 = vpop.f32.mrf.mxu0 }
0x1067   :  { %v3279_v3 = vadd.f32 %v3641_v2, %v3278_v1  ;;  %v3290_v4 = vadd.f32 %v3284_v0, %v4496_v20 }
0x1069   :  { %v3294_v7 = vsel %vm105_vm0, %v3290_v4, 0.0  ;;  %v3289_v50 = vadd.f32 %v3279_v3, %v4492_v23  ;;  %v3331_v23 = vld [vmem:[#allocation8 + $0xb0] sm:$0xff] }
0x106a   :  { %3295 = vadd.xlane.f32.xlu1 %v3294_v7  ;;  %3981 = vmatprep.subr.mxu1 %v3331_v23 }
0x106b   :  { %v3291_v52 = vsel %vm105_vm0, %v3289_v50, 0.0  ;;  %3982 = vmatpush3.msra.mxu1 %v3331_v23 }
0x106c   :  { %3292 = vadd.xlane.f32.xlu0 %v3291_v52  ;;  %3983 = vmatprep.subr.mxu1 %v3330_v16 }
0x106d   :  { %3984 = vmatpush3.msra.mxu1 %v3330_v16 }
0x106e   :  { %3985 = vmatprep.subr.mxu1 %v3329_v17 }
0x106f   :  { %3986 = vmatpush3.msra.mxu1 %v3329_v17 }
0x10f3   :  { %v3296_v8 = vpop.xlane.xlu1 %3295 }
0x10f4   :  { %v3298_v10 = vmul.f32 0.03125, %v3296_v8 }
0x10f5   :  { %v3293_v11 = vpop.xlane.xlu0 %3292 }
0x10f6   :  { %v3297_v51 = vmul.f32 0.03125, %v3293_v11  ;;  %v3300_v41 = vsub.f32 %v3290_v4, %v3298_v10 }
0x10f8   :  { %v3299_v12 = vsub.f32 %v3289_v50, %v3297_v51  ;;  %v3302_v14 = vmul.f32 %v3300_v41, %v3300_v41 }
0x10fa   :  { %v3301_v27 = vmul.f32 %v3299_v12, %v3299_v12  ;;  %v3306_v20 = vsel %vm105_vm0, %v3302_v14, 0.0 }
0x10fc   :  { %v3303_v13 = vsel %vm105_vm0, %v3301_v27, 0.0 }
0x10fd   :  { %3304 = vadd.xlane.f32.xlu0 %v3303_v13  ;;  %v3652_v13 = vld [vmem:[#allocation10 + $0xb] ss:$0 sm:$0xff] }
0x1101   :  { %3307 = vadd.xlane.f32.xlu0 %v3306_v20 }
0x1186   :  { %v3305_v26 = vpop.xlane.xlu0 %3304 }
0x1187   :  { %v3309_v28 = vmul.f32 0.03125, %v3305_v26 }
0x1189   :  { %v3311_v29 = vadd.f32 1e-05, %v3309_v28 }
0x118a   :  { %v3308_v30 = vpop.xlane.xlu0 %3307 }
0x118b   :  { %4094 = vrsqrt.f32 %v3311_v29  ;;  %v3310_v31 = vmul.f32 0.03125, %v3308_v30 }
0x118d   :  { %v3312_v32 = vadd.f32 1e-05, %v3310_v31 }
0x118f   :  { %4096 = vrsqrt.f32 %v3312_v32 }
0x1198   :  { %v4095_v33 = vpop.eup %4094 }
0x1199   :  { %v3315_v35 = vmul.f32 %v4095_v33, %v3299_v12 }
0x119b   :  { %v3321_v37 = vmul.f32 %v3644_v25, %v3315_v35 }
0x119c   :  { %v4097_v38 = vpop.eup %4096 }
0x119d   :  { %v3316_v39 = vmul.f32 %v4097_v38, %v3300_v41  ;;  %v3327_v34 = vadd.f32 %v3645_v36, %v3321_v37 }
0x119f   :  { %v3322_v42 = vmul.f32 %v3644_v25, %v3316_v39  ;;  %3987 = vmatprep.mubr.msk.f32.mxu1 %vm105_vm0, %v3327_v34 }
0x11a1   :  { %v3328_v43 = vadd.f32 %v3645_v36, %v3322_v42 }
0x11a3   :  { %3988 = vmatmul.mubr.msk.f32.vlgmr.msra.gmra.mxu1 %vm105_vm0, %v3328_v43 }
0x1263   :  { %v3989_v48 = vpop.f32.mrf.mxu1 }
0x1264   :  { %v3416_v49 = vadd.f32 %v3989_v48, %v3646_v47 }
0x1265   :  { %v3410_v53 = vpop.f32.mrf.mxu1 }
0x1266   :  { %v3411_v54 = vadd.f32 %v3646_v47, %v3410_v53  ;;  %v3420_v56 = vmax.f32 %v3416_v49, 0.0 }
0x1268   :  { %v3419_v55 = vmax.f32 %v3411_v54, 0.0 }
0x126a   :  { %4006 = vmatprep.mubr.msk.f32.mxu0 %vm3434_vm5, %v3419_v55 }
0x126b   :  { %4007 = vmatmul.mubr.msk.f32.vlgmr.msra.gmra.mxu0 %vm3434_vm5, %v3420_v56 }
0x132b   :  { %v4008_v57 = vpop.f32.mrf.mxu0 }
0x132c   :  { %v3513_v19 = vadd.f32 %v4008_v57, %v3649_v6 }
0x132d   :  { %v3507_v58 = vpop.f32.mrf.mxu0 }
0x132e   :  { %v3508_v9 = vadd.f32 %v3649_v6, %v3507_v58  ;;  %v3519_v59 = vadd.f32 %v3513_v19, %v3328_v43 }
0x1330   :  { %v3523_v60 = vsel %vm105_vm0, %v3519_v59, 0.0  ;;  %v3518_v61 = vadd.f32 %v3508_v9, %v3327_v34 }
0x1331   :  { %3524 = vadd.xlane.f32.xlu0 %v3523_v60 }
0x1332   :  { %v3520_v5 = vsel %vm105_vm0, %v3518_v61, 0.0 }
0x1333   :  { %3521 = vadd.xlane.f32.xlu1 %v3520_v5 }
0x13ba   :  { %v3525_v62 = vpop.xlane.xlu0 %3524 }
0x13bb   :  { %v3527_v2 = vmul.f32 0.03125, %v3525_v62 }
0x13bc   :  { %v3522_v63 = vpop.xlane.xlu1 %3521 }
0x13bd   :  { %v3529_v0 = vsub.f32 %v3519_v59, %v3527_v2  ;;  %v3526_v1 = vmul.f32 0.03125, %v3522_v63 }
0x13bf   :  { %v3528_v3 = vsub.f32 %v3518_v61, %v3526_v1  ;;  %v3531_v4 = vmul.f32 %v3529_v0, %v3529_v0 }
0x13c1   :  { %v3535_v7 = vsel %vm105_vm0, %v3531_v4, 0.0  ;;  %v3530_v50 = vmul.f32 %v3528_v3, %v3528_v3 }
0x13c2   :  { %3536 = vadd.xlane.f32.xlu0 %v3535_v7 }
0x13c3   :  { %v3532_v52 = vsel %vm105_vm0, %v3530_v50, 0.0 }
0x13c4   :  { %3533 = vadd.xlane.f32.xlu1 %v3532_v52 }
0x144b   :  { %v3537_v8 = vpop.xlane.xlu0 %3536 }
0x144c   :  { %v3539_v10 = vmul.f32 0.03125, %v3537_v8 }
0x144d   :  { %v3534_v11 = vpop.xlane.xlu1 %3533 }
0x144e   :  { %v3541_v51 = vadd.f32 1e-05, %v3539_v10  ;;  %v3538_v41 = vmul.f32 0.03125, %v3534_v11 }
0x1450   :  { %4098 = vrsqrt.f32 %v3541_v51  ;;  %v3540_v12 = vadd.f32 1e-05, %v3538_v41 }
0x1452   :  { %4100 = vrsqrt.f32 %v3540_v12 }
0x145d   :  { %v4099_v27 = vpop.eup %4098 }
0x145e   :  { %v3545_v14 = vmul.f32 %v4099_v27, %v3529_v0 }
0x145f   :  { %v4101_v20 = vpop.eup %4100 }
0x1460   :  { %v3544_v23 = vmul.f32 %v4101_v20, %v3528_v3  ;;  %v3551_v16 = vmul.f32 %v3652_v13, %v3545_v14 }
0x1462   :  { %v3550_v17 = vmul.f32 %v3652_v13, %v3544_v23  ;;  %v3557_v18 = vadd.f32 %v3653_v15, %v3551_v16 }
0x1464   :  { %v3556_v21 = vadd.f32 %v3653_v15, %v3550_v17  ;;  %3559 = vst.msk [vmem:[#allocation11 + $0x8] sm:$0xff] %vm105_vm0, %v3557_v18 }
0x1466   :  { %3558 = vst.msk [vmem:[#allocation11] sm:$0xff] %vm105_vm0, %v3556_v21 }
0x1467   :  { %4213 = shalt.err (!%p4210_p1)
}
0x1468   :  { %3571 = dma.vmem_to_hbm [thread:$0]  %s3566_s30, 256, %s4685_s6, [#allocation4], %s4232_s26, %s4232_s26, %s4233_s27  }
0x1469   :  { %4228 = dma.done.wait [#allocation4], 256  }
0x146a   :  { %4229 = vsyncadd [#allocation4], 4294967040 }
0x146b   :  { %3575 = vsyncpa [#allocation3], 1 }
0x146c   :  { %3576 = vsyncpa [#allocation6], 1 }
0x146d   :  { %3577 = vsyncpa [#allocation9], 1 }
0x146e   :  { %3578 = vsyncpa [#allocation4], 1 }

</bundles_post_ra>
